<compile_context>
chip_gen: v7x
topology: tpu7x:2x2x1
jax: 0.10.0
libtpu: 0.0.40
codegen_flags: <defaults>
</compile_context>

<pallas_src>
import jax
import jax.numpy as jnp
from jax import lax
from jax.experimental import pallas as pl
from jax.experimental.pallas import tpu as pltpu


def _round_up(x, m):
    return (x + m - 1) // m * m


# ----------------------------- Fused kernel ---------------------------------

def _make_bilstm_kernel(T, BP, H, compute_dtype):
    """Bidirectional LSTM + Linear embedding, fully fused, single invocation.

    Gate layout per direction (after host-side repacking): [i, f, o, g].
    xg / gates columns: [0:4H] = forward gates, [4H:8H] = backward gates.
    """
    H4 = 4 * H

    def kernel(x_ref, wih_ref, bx_ref, wblk_ref, wemb_ref, bemb_ref,
               o_ref, xg_ref, recf_ref, recb_ref):
        # ---- Hoisted input projection: all timesteps, both directions ------
        # (T*BP, nIn) @ (nIn, 8H), bf16 operands, f32 accumulation + f32 bias.
        xg_ref[...] = (jnp.dot(x_ref[...], wih_ref[...],
                               preferred_element_type=jnp.float32)
                       + bx_ref[...])                               # (T*BP, 8H) f32

        wblk = wblk_ref[...]                                        # (2H, 8H)

        zero = jnp.zeros((BP, H), jnp.float32)

        def step(t, carry):
            h_f, c_f, h_b, c_b = carry
            tb = T - 1 - t
            rf = pl.multiple_of(t * BP, BP)      # BP is a multiple of 8 -> aligned
            rb = pl.multiple_of(tb * BP, BP)

            xg_t = xg_ref[pl.ds(rf, BP), :]      # forward gates live in [:, :4H]
            xg_tb = xg_ref[pl.ds(rb, BP), :]     # backward gates live in [:, 4H:]

            # One fused recurrent matmul for BOTH directions (block-diag W_hh).
            h_cat = jnp.concatenate([h_f, h_b], axis=-1).astype(compute_dtype)
            rec_g = jnp.dot(h_cat, wblk,
                            preferred_element_type=jnp.float32)     # (BP, 8H)

            gf = rec_g[:, :H4] + xg_t[:, :H4]    # forward  gates [i, f, o | g]
            gb = rec_g[:, H4:] + xg_tb[:, H4:]   # backward gates [i, f, o | g]

            # sigmoid only on [i,f,o] (3H), tanh only on g (H) per direction.
            sg_f = jax.nn.sigmoid(gf[:, :3 * H])
            sg_b = jax.nn.sigmoid(gb[:, :3 * H])
            g_f = jnp.tanh(gf[:, 3 * H:])
            g_b = jnp.tanh(gb[:, 3 * H:])

            c_f = sg_f[:, H:2 * H] * c_f + sg_f[:, :H] * g_f
            c_b = sg_b[:, H:2 * H] * c_b + sg_b[:, :H] * g_b
            h_f = sg_f[:, 2 * H:] * jnp.tanh(c_f)
            h_b = sg_b[:, 2 * H:] * jnp.tanh(c_b)

            # Tile-aligned full-width scratch stores (forward at t, backward
            # at T-1-t), kept in f32 so the (8,128) tiling stays trivial.
            recf_ref[pl.ds(rf, BP), :] = h_f
            recb_ref[pl.ds(rb, BP), :] = h_b
            return h_f, c_f, h_b, c_b

        # T is small & static here -> full unroll; at production T use a
        # partial unroll factor (and a T-chunked grid on v7x).
        lax.fori_loop(0, T, step, (zero, zero, zero, zero), unroll=True)

        # ---- Fused Linear (embedding) epilogue: SINGLE dot ------------------
        # out = [rec_f | rec_b] @ W_emb + b, with nOut padded to 128 lanes so
        # the output store is lane-dense.
        rec = jnp.concatenate([recf_ref[...], recb_ref[...]], axis=-1)
        o_ref[...] = (jnp.dot(rec.astype(compute_dtype), wemb_ref[...],
                              preferred_element_type=jnp.float32)
                      + bemb_ref[...])

    return kernel


def bidirectional_lstm_forward(x, pk, *, compute_dtype=jnp.bfloat16):
    """x: (T, B, nIn) -> (T, B, nOut), matching PyTorch BidirectionalLSTM."""
    T, B, nIn = x.shape
    H = pk["w_blk"].shape[0] // 2
    nOut_pad = pk["w_emb"].shape[1]
    nOut = pk["nOut"]
    BP = _round_up(B, 8)                     # sublane-aligned batch
    f32 = jnp.float32

    # Pad batch to a multiple of 8 (padded rows are computed then discarded).
    x_p = jnp.pad(x, ((0, 0), (0, BP - B), (0, 0)))
    x_flat = x_p.reshape(T * BP, nIn).astype(compute_dtype)

    # Matmul operands in compute dtype (bf16 halves HBM->VMEM weight bytes);
    # biases stay f32.
    wih = pk["wih_all"].astype(compute_dtype)
    wblk = pk["w_blk"].astype(compute_dtype)
    wemb = pk["w_emb"].astype(compute_dtype)

    def full(shape):
        return pl.BlockSpec(shape, lambda i: (0,) * len(shape))

    out_flat = pl.pallas_call(
        _make_bilstm_kernel(T, BP, H, compute_dtype),
        out_shape=jax.ShapeDtypeStruct((T * BP, nOut_pad), f32),
        grid_spec=pltpu.PrefetchScalarGridSpec(
            num_scalar_prefetch=0,
            grid=(1,),
            in_specs=[
                full((T * BP, nIn)),          # x (flattened, padded batch)
                full((nIn, 8 * H)),           # W_ih, both directions, [i,f,o,g]
                full((1, 8 * H)),             # combined biases (f32)
                full((2 * H, 8 * H)),         # block-diag recurrent weights
                full((2 * H, nOut_pad)),      # W_emb (unsplit, lane-padded)
                full((1, nOut_pad)),          # embedding bias (f32, padded)
            ],
            out_specs=full((T * BP, nOut_pad)),
            scratch_shapes=[
                pltpu.VMEM((T * BP, 8 * H), f32),   # hoisted input projection
                pltpu.VMEM((T * BP, H), f32),       # forward hidden sequence
                pltpu.VMEM((T * BP, H), f32),       # backward hidden sequence
            ],
        ),
        compiler_params=pltpu.CompilerParams(
            dimension_semantics=("arbitrary",)),
    )(x_flat, wih, pk["b_all"], wblk, wemb, pk["b_emb"])

    return out_flat.reshape(T, BP, nOut_pad)[:, :B, :nOut]


# ----------------------------- Parameters ------------------------------------

def init_raw_params(key, nIn, H, nOut):
    """PyTorch-shaped nn.LSTM(bidirectional) + nn.Linear parameters."""
    ks = jax.random.split(key, 10)
    s = 1.0 / jnp.sqrt(H)
    se = 1.0 / jnp.sqrt(2 * H)

    def u(k, shape, scale):
        return jax.random.uniform(k, shape, jnp.float32, -scale, scale)

    return dict(
        wih_f=u(ks[0], (4 * H, nIn), s), whh_f=u(ks[1], (4 * H, H), s),
        bih_f=u(ks[2], (4 * H,), s),     bhh_f=u(ks[3], (4 * H,), s),
        wih_b=u(ks[4], (4 * H, nIn), s), whh_b=u(ks[5], (4 * H, H), s),
        bih_b=u(ks[6], (4 * H,), s),     bhh_b=u(ks[7], (4 * H,), s),
        w_emb=u(ks[8], (nOut, 2 * H), se), b_emb=u(ks[9], (nOut,), se),
    )


def pack_params(raw, H, nOut, lane=128):
    """Repack PyTorch [i,f,g,o] params into the kernel layout."""

    def ifog(w):  # PyTorch gate order [i,f,g,o] -> kernel order [i,f,o,g]
        return jnp.concatenate([w[:2 * H], w[3 * H:], w[2 * H:3 * H]], axis=0)

    wih_all = jnp.concatenate([ifog(raw["wih_f"]).T,
                               ifog(raw["wih_b"]).T], axis=1)          # (nIn, 8H)
    b_all = jnp.concatenate([ifog(raw["bih_f"] + raw["bhh_f"]),
                             ifog(raw["bih_b"] + raw["bhh_b"])])[None, :]  # (1, 8H)

    # Block-diagonal recurrent weights: rows [0:H] -> forward gate columns,
    # rows [H:2H] -> backward gate columns.
    w_blk = jnp.zeros((2 * H, 8 * H), jnp.float32)
    w_blk = w_blk.at[:H, :4 * H].set(ifog(raw["whh_f"]).T)
    w_blk = w_blk.at[H:, 4 * H:].set(ifog(raw["whh_b"]).T)

    # Embedding weight/bias padded to a multiple of 128 output lanes.
    nOut_pad = _round_up(nOut, lane)
    w_emb = jnp.zeros((2 * H, nOut_pad), jnp.float32).at[:, :nOut].set(
        raw["w_emb"].T)
    b_emb = jnp.zeros((1, nOut_pad), jnp.float32).at[:, :nOut].set(
        raw["b_emb"][None, :])

    return dict(wih_all=wih_all, b_all=b_all, w_blk=w_blk,
                w_emb=w_emb, b_emb=b_emb, nOut=nOut)


# ----------------------------- Pure-JAX reference ----------------------------

def ref_forward(x, raw):
    """Independent f32 reference with PyTorch LSTM semantics (order [i,f,g,o])."""
    H = raw["whh_f"].shape[1]

    def run(xseq, wih, whh, bih, bhh):
        B = xseq.shape[1]

        def step(carry, xt):
            h, c = carry
            g = xt @ wih.T + h @ whh.T + bih + bhh
            i = jax.nn.sigmoid(g[:, :H])
            f = jax.nn.sigmoid(g[:, H:2 * H])
            gg = jnp.tanh(g[:, 2 * H:3 * H])
            o = jax.nn.sigmoid(g[:, 3 * H:])
            c = f * c + i * gg
            h = o * jnp.tanh(c)
            return (h, c), h

        init = (jnp.zeros((B, H), jnp.float32), jnp.zeros((B, H), jnp.float32))
        _, hs = lax.scan(step, init, xseq)
        return hs

    hf = run(x, raw["wih_f"], raw["whh_f"], raw["bih_f"], raw["bhh_f"])
    hb = run(x[::-1], raw["wih_b"], raw["whh_b"], raw["bih_b"], raw["bhh_b"])[::-1]
    rec = jnp.concatenate([hf, hb], axis=-1)          # (T, B, 2H)
    return rec @ raw["w_emb"].T + raw["b_emb"]        # (T, B, nOut)


# ----------------------------------- main -------------------------------------

if __name__ == "__main__":
    T, B, nIn, H, nOut = 8, 2, 16, 32, 16

    key = jax.random.PRNGKey(0)
    kx, kp = jax.random.split(key)
    x = jax.random.normal(kx, (T, B, nIn), jnp.float32)
    raw = init_raw_params(kp, nIn, H, nOut)
    packed = pack_params(raw, H, nOut)

    ref = jax.block_until_ready(ref_forward(x, raw))

    # f32 path: tight structural check against the PyTorch-semantics reference.
    out_f32 = jax.block_until_ready(
        bidirectional_lstm_forward(x, packed, compute_dtype=jnp.float32))
    assert out_f32.shape == (T, B, nOut), out_f32.shape
    err32 = float(jnp.max(jnp.abs(out_f32 - ref)))
    assert jnp.allclose(out_f32, ref, rtol=1e-4, atol=1e-4), err32

    # bf16-operand path (MXU-native, f32 accumulation/state): sanity-bounded
    # against the f32 reference (reduced-precision drift only).
    out_bf16 = jax.block_until_ready(
        bidirectional_lstm_forward(x, packed, compute_dtype=jnp.bfloat16))
    assert out_bf16.shape == (T, B, nOut), out_bf16.shape
    assert bool(jnp.all(jnp.isfinite(out_bf16))), "non-finite bf16 output"
    errbf = float(jnp.max(jnp.abs(out_bf16 - ref)))
    assert errbf < 1e-1, errbf

    print("KERNEL_OK")
</pallas_src>

<mosaic_0001>
module attributes {stable_mosaic.version = 11 : i64} {
  func.func @kernel(%arg0: i32, %arg1: memref<64x16xf32, #tpu.memory_space<vmem>>, %arg2: memref<16x256xf32, #tpu.memory_space<vmem>>, %arg3: memref<1x256xf32, #tpu.memory_space<vmem>>, %arg4: memref<64x256xf32, #tpu.memory_space<vmem>>, %arg5: memref<64x128xf32, #tpu.memory_space<vmem>>, %arg6: memref<1x128xf32, #tpu.memory_space<vmem>>, %arg7: memref<64x128xf32, #tpu.memory_space<vmem>>, %arg8: memref<64x256xf32, #tpu.memory_space<vmem>>, %arg9: memref<64x32xf32, #tpu.memory_space<vmem>>, %arg10: memref<64x32xf32, #tpu.memory_space<vmem>>) attributes {dimension_semantics = [#tpu.dimension_semantics<arbitrary>], iteration_bounds = array<i64: 1>, scalar_prefetch = 0 : i64, scratch_operands = 3 : i64, tpu.core_type = #tpu.core_type<tc>, window_params = [{pipeline_mode = #tpu.pipeline_mode<synchronous>, transform_indices = @transform_0, window_bounds = array<i64: 64, 16>}, {pipeline_mode = #tpu.pipeline_mode<synchronous>, transform_indices = @transform_1, window_bounds = array<i64: 16, 256>}, {pipeline_mode = #tpu.pipeline_mode<synchronous>, transform_indices = @transform_2, window_bounds = array<i64: 1, 256>}, {pipeline_mode = #tpu.pipeline_mode<synchronous>, transform_indices = @transform_3, window_bounds = array<i64: 64, 256>}, {pipeline_mode = #tpu.pipeline_mode<synchronous>, transform_indices = @transform_4, window_bounds = array<i64: 64, 128>}, {pipeline_mode = #tpu.pipeline_mode<synchronous>, transform_indices = @transform_5, window_bounds = array<i64: 1, 128>}, {pipeline_mode = #tpu.pipeline_mode<synchronous>, transform_indices = @transform_6, window_bounds = array<i64: 64, 128>}]} {
    %c0 = arith.constant 0 : index
    %c0_0 = arith.constant 0 : index
    %0 = vector.load %arg1[%c0, %c0_0] : memref<64x16xf32, #tpu.memory_space<vmem>>, vector<64x16xf32>
    %c0_1 = arith.constant 0 : index
    %c0_2 = arith.constant 0 : index
    %1 = vector.load %arg2[%c0_1, %c0_2] : memref<16x256xf32, #tpu.memory_space<vmem>>, vector<16x256xf32>
    %cst = arith.constant dense<0.000000e+00> : vector<64x256xf32>
    %2 = tpu.matmul %0, %1, %cst {dimension_numbers = #tpu.dot_dimension_numbers<[1], [0], [0], [1], [0, 0, 1, 1], [], []>} : vector<64x16xf32>, vector<16x256xf32>, vector<64x256xf32> -> vector<64x256xf32>
    %c0_3 = arith.constant 0 : index
    %c0_4 = arith.constant 0 : index
    %3 = vector.load %arg3[%c0_3, %c0_4] : memref<1x256xf32, #tpu.memory_space<vmem>>, vector<1x256xf32>
    %4 = vector.broadcast %3 : vector<1x256xf32> to vector<64x256xf32>
    %5 = arith.addf %2, %4 : vector<64x256xf32>
    %c0_5 = arith.constant 0 : index
    %c0_6 = arith.constant 0 : index
    %6 = vector.load %arg8[%c0_5, %c0_6] : memref<64x256xf32, #tpu.memory_space<vmem>>, vector<64x256xf32>
    tpu.vector_store %arg8[%c0_5, %c0_6], %5 {strides = array<i32>} : memref<64x256xf32, #tpu.memory_space<vmem>>, vector<64x256xf32>,
    %c0_7 = arith.constant 0 : index
    %c0_8 = arith.constant 0 : index
    %7 = vector.load %arg4[%c0_7, %c0_8] : memref<64x256xf32, #tpu.memory_space<vmem>>, vector<64x256xf32>
    %cst_9 = arith.constant 0.000000e+00 : f32
    %8 = vector.broadcast %cst_9 : f32 to vector<8x32xf32>
    %c0_i32 = arith.constant 0 : i32
    %c7_i32 = arith.constant 7 : i32
    %9 = arith.subi %c7_i32, %c0_i32 : i32
    %c8_i32 = arith.constant 8 : i32
    %10 = arith.muli %c0_i32, %c8_i32 : i32
    %11 = tpu.assume_multiple %10, 8 : i32
    %c8_i32_10 = arith.constant 8 : i32
    %12 = arith.muli %9, %c8_i32_10 : i32
    %13 = tpu.assume_multiple %12, 8 : i32
    %14 = arith.index_cast %11 : i32 to index
    %c0_11 = arith.constant 0 : index
    %15 = vector.load %arg8[%14, %c0_11] : memref<64x256xf32, #tpu.memory_space<vmem>>, vector<8x256xf32>
    %16 = arith.index_cast %13 : i32 to index
    %c0_12 = arith.constant 0 : index
    %17 = vector.load %arg8[%16, %c0_12] : memref<64x256xf32, #tpu.memory_space<vmem>>, vector<8x256xf32>
    %18 = tpu.concatenate %8, %8 in 1 : vector<8x32xf32>, vector<8x32xf32> -> vector<8x64xf32>
    %cst_13 = arith.constant dense<0.000000e+00> : vector<8x256xf32>
    %19 = tpu.matmul %18, %7, %cst_13 {dimension_numbers = #tpu.dot_dimension_numbers<[1], [0], [0], [1], [0, 0, 1, 1], [], []>} : vector<8x64xf32>, vector<64x256xf32>, vector<8x256xf32> -> vector<8x256xf32>
    %20 = vector.extract_strided_slice %19 {offsets = [0, 0], sizes = [8, 128], strides = [1, 1]} : vector<8x256xf32> to vector<8x128xf32>
    %21 = vector.extract_strided_slice %15 {offsets = [0, 0], sizes = [8, 128], strides = [1, 1]} : vector<8x256xf32> to vector<8x128xf32>
    %22 = arith.addf %20, %21 : vector<8x128xf32>
    %23 = vector.extract_strided_slice %19 {offsets = [0, 128], sizes = [8, 128], strides = [1, 1]} : vector<8x256xf32> to vector<8x128xf32>
    %24 = vector.extract_strided_slice %17 {offsets = [0, 128], sizes = [8, 128], strides = [1, 1]} : vector<8x256xf32> to vector<8x128xf32>
    %25 = arith.addf %23, %24 : vector<8x128xf32>
    %26 = vector.extract_strided_slice %22 {offsets = [0, 0], sizes = [8, 96], strides = [1, 1]} : vector<8x128xf32> to vector<8x96xf32>
    %27 = arith.negf %26 : vector<8x96xf32>
    %28 = math.exp %27 : vector<8x96xf32>
    %cst_14 = arith.constant 1.000000e+00 : f32
    %29 = vector.broadcast %cst_14 : f32 to vector<8x96xf32>
    %30 = arith.addf %29, %28 : vector<8x96xf32>
    %31 = arith.divf %29, %30 : vector<8x96xf32>
    %32 = vector.extract_strided_slice %25 {offsets = [0, 0], sizes = [8, 96], strides = [1, 1]} : vector<8x128xf32> to vector<8x96xf32>
    %33 = arith.negf %32 : vector<8x96xf32>
    %34 = math.exp %33 : vector<8x96xf32>
    %cst_15 = arith.constant 1.000000e+00 : f32
    %35 = vector.broadcast %cst_15 : f32 to vector<8x96xf32>
    %36 = arith.addf %35, %34 : vector<8x96xf32>
    %37 = arith.divf %35, %36 : vector<8x96xf32>
    %38 = vector.extract_strided_slice %22 {offsets = [0, 96], sizes = [8, 32], strides = [1, 1]} : vector<8x128xf32> to vector<8x32xf32>
    %39 = math.tanh %38 : vector<8x32xf32>
    %40 = vector.extract_strided_slice %25 {offsets = [0, 96], sizes = [8, 32], strides = [1, 1]} : vector<8x128xf32> to vector<8x32xf32>
    %41 = math.tanh %40 : vector<8x32xf32>
    %42 = vector.extract_strided_slice %31 {offsets = [0, 32], sizes = [8, 32], strides = [1, 1]} : vector<8x96xf32> to vector<8x32xf32>
    %43 = arith.mulf %42, %8 : vector<8x32xf32>
    %44 = vector.extract_strided_slice %31 {offsets = [0, 0], sizes = [8, 32], strides = [1, 1]} : vector<8x96xf32> to vector<8x32xf32>
    %45 = arith.mulf %44, %39 : vector<8x32xf32>
    %46 = arith.addf %43, %45 : vector<8x32xf32>
    %47 = vector.extract_strided_slice %37 {offsets = [0, 32], sizes = [8, 32], strides = [1, 1]} : vector<8x96xf32> to vector<8x32xf32>
    %48 = arith.mulf %47, %8 : vector<8x32xf32>
    %49 = vector.extract_strided_slice %37 {offsets = [0, 0], sizes = [8, 32], strides = [1, 1]} : vector<8x96xf32> to vector<8x32xf32>
    %50 = arith.mulf %49, %41 : vector<8x32xf32>
    %51 = arith.addf %48, %50 : vector<8x32xf32>
    %52 = vector.extract_strided_slice %31 {offsets = [0, 64], sizes = [8, 32], strides = [1, 1]} : vector<8x96xf32> to vector<8x32xf32>
    %53 = math.tanh %46 : vector<8x32xf32>
    %54 = arith.mulf %52, %53 : vector<8x32xf32>
    %55 = vector.extract_strided_slice %37 {offsets = [0, 64], sizes = [8, 32], strides = [1, 1]} : vector<8x96xf32> to vector<8x32xf32>
    %56 = math.tanh %51 : vector<8x32xf32>
    %57 = arith.mulf %55, %56 : vector<8x32xf32>
    %58 = arith.index_cast %11 : i32 to index
    %c0_16 = arith.constant 0 : index
    %59 = vector.load %arg9[%58, %c0_16] : memref<64x32xf32, #tpu.memory_space<vmem>>, vector<8x32xf32>
    tpu.vector_store %arg9[%58, %c0_16], %54 {strides = array<i32>} : memref<64x32xf32, #tpu.memory_space<vmem>>, vector<8x32xf32>,
    %60 = arith.index_cast %13 : i32 to index
    %c0_17 = arith.constant 0 : index
    %61 = vector.load %arg10[%60, %c0_17] : memref<64x32xf32, #tpu.memory_space<vmem>>, vector<8x32xf32>
    tpu.vector_store %arg10[%60, %c0_17], %57 {strides = array<i32>} : memref<64x32xf32, #tpu.memory_space<vmem>>, vector<8x32xf32>,
    %c1_i32 = arith.constant 1 : i32
    %c7_i32_18 = arith.constant 7 : i32
    %62 = arith.subi %c7_i32_18, %c1_i32 : i32
    %c8_i32_19 = arith.constant 8 : i32
    %63 = arith.muli %c1_i32, %c8_i32_19 : i32
    %64 = tpu.assume_multiple %63, 8 : i32
    %c8_i32_20 = arith.constant 8 : i32
    %65 = arith.muli %62, %c8_i32_20 : i32
    %66 = tpu.assume_multiple %65, 8 : i32
    %67 = arith.index_cast %64 : i32 to index
    %c0_21 = arith.constant 0 : index
    %68 = vector.load %arg8[%67, %c0_21] : memref<64x256xf32, #tpu.memory_space<vmem>>, vector<8x256xf32>
    %69 = arith.index_cast %66 : i32 to index
    %c0_22 = arith.constant 0 : index
    %70 = vector.load %arg8[%69, %c0_22] : memref<64x256xf32, #tpu.memory_space<vmem>>, vector<8x256xf32>
    %71 = tpu.concatenate %54, %57 in 1 : vector<8x32xf32>, vector<8x32xf32> -> vector<8x64xf32>
    %cst_23 = arith.constant dense<0.000000e+00> : vector<8x256xf32>
    %72 = tpu.matmul %71, %7, %cst_23 {dimension_numbers = #tpu.dot_dimension_numbers<[1], [0], [0], [1], [0, 0, 1, 1], [], []>} : vector<8x64xf32>, vector<64x256xf32>, vector<8x256xf32> -> vector<8x256xf32>
    %73 = vector.extract_strided_slice %72 {offsets = [0, 0], sizes = [8, 128], strides = [1, 1]} : vector<8x256xf32> to vector<8x128xf32>
    %74 = vector.extract_strided_slice %68 {offsets = [0, 0], sizes = [8, 128], strides = [1, 1]} : vector<8x256xf32> to vector<8x128xf32>
    %75 = arith.addf %73, %74 : vector<8x128xf32>
    %76 = vector.extract_strided_slice %72 {offsets = [0, 128], sizes = [8, 128], strides = [1, 1]} : vector<8x256xf32> to vector<8x128xf32>
    %77 = vector.extract_strided_slice %70 {offsets = [0, 128], sizes = [8, 128], strides = [1, 1]} : vector<8x256xf32> to vector<8x128xf32>
    %78 = arith.addf %76, %77 : vector<8x128xf32>
    %79 = vector.extract_strided_slice %75 {offsets = [0, 0], sizes = [8, 96], strides = [1, 1]} : vector<8x128xf32> to vector<8x96xf32>
    %80 = arith.negf %79 : vector<8x96xf32>
    %81 = math.exp %80 : vector<8x96xf32>
    %cst_24 = arith.constant 1.000000e+00 : f32
    %82 = vector.broadcast %cst_24 : f32 to vector<8x96xf32>
    %83 = arith.addf %82, %81 : vector<8x96xf32>
    %84 = arith.divf %82, %83 : vector<8x96xf32>
    %85 = vector.extract_strided_slice %78 {offsets = [0, 0], sizes = [8, 96], strides = [1, 1]} : vector<8x128xf32> to vector<8x96xf32>
    %86 = arith.negf %85 : vector<8x96xf32>
    %87 = math.exp %86 : vector<8x96xf32>
    %cst_25 = arith.constant 1.000000e+00 : f32
    %88 = vector.broadcast %cst_25 : f32 to vector<8x96xf32>
    %89 = arith.addf %88, %87 : vector<8x96xf32>
    %90 = arith.divf %88, %89 : vector<8x96xf32>
    %91 = vector.extract_strided_slice %75 {offsets = [0, 96], sizes = [8, 32], strides = [1, 1]} : vector<8x128xf32> to vector<8x32xf32>
    %92 = math.tanh %91 : vector<8x32xf32>
    %93 = vector.extract_strided_slice %78 {offsets = [0, 96], sizes = [8, 32], strides = [1, 1]} : vector<8x128xf32> to vector<8x32xf32>
    %94 = math.tanh %93 : vector<8x32xf32>
    %95 = vector.extract_strided_slice %84 {offsets = [0, 32], sizes = [8, 32], strides = [1, 1]} : vector<8x96xf32> to vector<8x32xf32>
    %96 = arith.mulf %95, %46 : vector<8x32xf32>
    %97 = vector.extract_strided_slice %84 {offsets = [0, 0], sizes = [8, 32], strides = [1, 1]} : vector<8x96xf32> to vector<8x32xf32>
    %98 = arith.mulf %97, %92 : vector<8x32xf32>
    %99 = arith.addf %96, %98 : vector<8x32xf32>
    %100 = vector.extract_strided_slice %90 {offsets = [0, 32], sizes = [8, 32], strides = [1, 1]} : vector<8x96xf32> to vector<8x32xf32>
    %101 = arith.mulf %100, %51 : vector<8x32xf32>
    %102 = vector.extract_strided_slice %90 {offsets = [0, 0], sizes = [8, 32], strides = [1, 1]} : vector<8x96xf32> to vector<8x32xf32>
    %103 = arith.mulf %102, %94 : vector<8x32xf32>
    %104 = arith.addf %101, %103 : vector<8x32xf32>
    %105 = vector.extract_strided_slice %84 {offsets = [0, 64], sizes = [8, 32], strides = [1, 1]} : vector<8x96xf32> to vector<8x32xf32>
    %106 = math.tanh %99 : vector<8x32xf32>
    %107 = arith.mulf %105, %106 : vector<8x32xf32>
    %108 = vector.extract_strided_slice %90 {offsets = [0, 64], sizes = [8, 32], strides = [1, 1]} : vector<8x96xf32> to vector<8x32xf32>
    %109 = math.tanh %104 : vector<8x32xf32>
    %110 = arith.mulf %108, %109 : vector<8x32xf32>
    %111 = arith.index_cast %64 : i32 to index
    %c0_26 = arith.constant 0 : index
    %112 = vector.load %arg9[%111, %c0_26] : memref<64x32xf32, #tpu.memory_space<vmem>>, vector<8x32xf32>
    tpu.vector_store %arg9[%111, %c0_26], %107 {strides = array<i32>} : memref<64x32xf32, #tpu.memory_space<vmem>>, vector<8x32xf32>,
    %113 = arith.index_cast %66 : i32 to index
    %c0_27 = arith.constant 0 : index
    %114 = vector.load %arg10[%113, %c0_27] : memref<64x32xf32, #tpu.memory_space<vmem>>, vector<8x32xf32>
    tpu.vector_store %arg10[%113, %c0_27], %110 {strides = array<i32>} : memref<64x32xf32, #tpu.memory_space<vmem>>, vector<8x32xf32>,
    %c2_i32 = arith.constant 2 : i32
    %c7_i32_28 = arith.constant 7 : i32
    %115 = arith.subi %c7_i32_28, %c2_i32 : i32
    %c8_i32_29 = arith.constant 8 : i32
    %116 = arith.muli %c2_i32, %c8_i32_29 : i32
    %117 = tpu.assume_multiple %116, 8 : i32
    %c8_i32_30 = arith.constant 8 : i32
    %118 = arith.muli %115, %c8_i32_30 : i32
    %119 = tpu.assume_multiple %118, 8 : i32
    %120 = arith.index_cast %117 : i32 to index
    %c0_31 = arith.constant 0 : index
    %121 = vector.load %arg8[%120, %c0_31] : memref<64x256xf32, #tpu.memory_space<vmem>>, vector<8x256xf32>
    %122 = arith.index_cast %119 : i32 to index
    %c0_32 = arith.constant 0 : index
    %123 = vector.load %arg8[%122, %c0_32] : memref<64x256xf32, #tpu.memory_space<vmem>>, vector<8x256xf32>
    %124 = tpu.concatenate %107, %110 in 1 : vector<8x32xf32>, vector<8x32xf32> -> vector<8x64xf32>
    %cst_33 = arith.constant dense<0.000000e+00> : vector<8x256xf32>
    %125 = tpu.matmul %124, %7, %cst_33 {dimension_numbers = #tpu.dot_dimension_numbers<[1], [0], [0], [1], [0, 0, 1, 1], [], []>} : vector<8x64xf32>, vector<64x256xf32>, vector<8x256xf32> -> vector<8x256xf32>
    %126 = vector.extract_strided_slice %125 {offsets = [0, 0], sizes = [8, 128], strides = [1, 1]} : vector<8x256xf32> to vector<8x128xf32>
    %127 = vector.extract_strided_slice %121 {offsets = [0, 0], sizes = [8, 128], strides = [1, 1]} : vector<8x256xf32> to vector<8x128xf32>
    %128 = arith.addf %126, %127 : vector<8x128xf32>
    %129 = vector.extract_strided_slice %125 {offsets = [0, 128], sizes = [8, 128], strides = [1, 1]} : vector<8x256xf32> to vector<8x128xf32>
    %130 = vector.extract_strided_slice %123 {offsets = [0, 128], sizes = [8, 128], strides = [1, 1]} : vector<8x256xf32> to vector<8x128xf32>
    %131 = arith.addf %129, %130 : vector<8x128xf32>
    %132 = vector.extract_strided_slice %128 {offsets = [0, 0], sizes = [8, 96], strides = [1, 1]} : vector<8x128xf32> to vector<8x96xf32>
    %133 = arith.negf %132 : vector<8x96xf32>
    %134 = math.exp %133 : vector<8x96xf32>
    %cst_34 = arith.constant 1.000000e+00 : f32
    %135 = vector.broadcast %cst_34 : f32 to vector<8x96xf32>
    %136 = arith.addf %135, %134 : vector<8x96xf32>
    %137 = arith.divf %135, %136 : vector<8x96xf32>
    %138 = vector.extract_strided_slice %131 {offsets = [0, 0], sizes = [8, 96], strides = [1, 1]} : vector<8x128xf32> to vector<8x96xf32>
    %139 = arith.negf %138 : vector<8x96xf32>
    %140 = math.exp %139 : vector<8x96xf32>
    %cst_35 = arith.constant 1.000000e+00 : f32
    %141 = vector.broadcast %cst_35 : f32 to vector<8x96xf32>
    %142 = arith.addf %141, %140 : vector<8x96xf32>
    %143 = arith.divf %141, %142 : vector<8x96xf32>
    %144 = vector.extract_strided_slice %128 {offsets = [0, 96], sizes = [8, 32], strides = [1, 1]} : vector<8x128xf32> to vector<8x32xf32>
    %145 = math.tanh %144 : vector<8x32xf32>
    %146 = vector.extract_strided_slice %131 {offsets = [0, 96], sizes = [8, 32], strides = [1, 1]} : vector<8x128xf32> to vector<8x32xf32>
    %147 = math.tanh %146 : vector<8x32xf32>
    %148 = vector.extract_strided_slice %137 {offsets = [0, 32], sizes = [8, 32], strides = [1, 1]} : vector<8x96xf32> to vector<8x32xf32>
    %149 = arith.mulf %148, %99 : vector<8x32xf32>
    %150 = vector.extract_strided_slice %137 {offsets = [0, 0], sizes = [8, 32], strides = [1, 1]} : vector<8x96xf32> to vector<8x32xf32>
    %151 = arith.mulf %150, %145 : vector<8x32xf32>
    %152 = arith.addf %149, %151 : vector<8x32xf32>
    %153 = vector.extract_strided_slice %143 {offsets = [0, 32], sizes = [8, 32], strides = [1, 1]} : vector<8x96xf32> to vector<8x32xf32>
    %154 = arith.mulf %153, %104 : vector<8x32xf32>
    %155 = vector.extract_strided_slice %143 {offsets = [0, 0], sizes = [8, 32], strides = [1, 1]} : vector<8x96xf32> to vector<8x32xf32>
    %156 = arith.mulf %155, %147 : vector<8x32xf32>
    %157 = arith.addf %154, %156 : vector<8x32xf32>
    %158 = vector.extract_strided_slice %137 {offsets = [0, 64], sizes = [8, 32], strides = [1, 1]} : vector<8x96xf32> to vector<8x32xf32>
    %159 = math.tanh %152 : vector<8x32xf32>
    %160 = arith.mulf %158, %159 : vector<8x32xf32>
    %161 = vector.extract_strided_slice %143 {offsets = [0, 64], sizes = [8, 32], strides = [1, 1]} : vector<8x96xf32> to vector<8x32xf32>
    %162 = math.tanh %157 : vector<8x32xf32>
    %163 = arith.mulf %161, %162 : vector<8x32xf32>
    %164 = arith.index_cast %117 : i32 to index
    %c0_36 = arith.constant 0 : index
    %165 = vector.load %arg9[%164, %c0_36] : memref<64x32xf32, #tpu.memory_space<vmem>>, vector<8x32xf32>
    tpu.vector_store %arg9[%164, %c0_36], %160 {strides = array<i32>} : memref<64x32xf32, #tpu.memory_space<vmem>>, vector<8x32xf32>,
    %166 = arith.index_cast %119 : i32 to index
    %c0_37 = arith.constant 0 : index
    %167 = vector.load %arg10[%166, %c0_37] : memref<64x32xf32, #tpu.memory_space<vmem>>, vector<8x32xf32>
    tpu.vector_store %arg10[%166, %c0_37], %163 {strides = array<i32>} : memref<64x32xf32, #tpu.memory_space<vmem>>, vector<8x32xf32>,
    %c3_i32 = arith.constant 3 : i32
    %c7_i32_38 = arith.constant 7 : i32
    %168 = arith.subi %c7_i32_38, %c3_i32 : i32
    %c8_i32_39 = arith.constant 8 : i32
    %169 = arith.muli %c3_i32, %c8_i32_39 : i32
    %170 = tpu.assume_multiple %169, 8 : i32
    %c8_i32_40 = arith.constant 8 : i32
    %171 = arith.muli %168, %c8_i32_40 : i32
    %172 = tpu.assume_multiple %171, 8 : i32
    %173 = arith.index_cast %170 : i32 to index
    %c0_41 = arith.constant 0 : index
    %174 = vector.load %arg8[%173, %c0_41] : memref<64x256xf32, #tpu.memory_space<vmem>>, vector<8x256xf32>
    %175 = arith.index_cast %172 : i32 to index
    %c0_42 = arith.constant 0 : index
    %176 = vector.load %arg8[%175, %c0_42] : memref<64x256xf32, #tpu.memory_space<vmem>>, vector<8x256xf32>
    %177 = tpu.concatenate %160, %163 in 1 : vector<8x32xf32>, vector<8x32xf32> -> vector<8x64xf32>
    %cst_43 = arith.constant dense<0.000000e+00> : vector<8x256xf32>
    %178 = tpu.matmul %177, %7, %cst_43 {dimension_numbers = #tpu.dot_dimension_numbers<[1], [0], [0], [1], [0, 0, 1, 1], [], []>} : vector<8x64xf32>, vector<64x256xf32>, vector<8x256xf32> -> vector<8x256xf32>
    %179 = vector.extract_strided_slice %178 {offsets = [0, 0], sizes = [8, 128], strides = [1, 1]} : vector<8x256xf32> to vector<8x128xf32>
    %180 = vector.extract_strided_slice %174 {offsets = [0, 0], sizes = [8, 128], strides = [1, 1]} : vector<8x256xf32> to vector<8x128xf32>
    %181 = arith.addf %179, %180 : vector<8x128xf32>
    %182 = vector.extract_strided_slice %178 {offsets = [0, 128], sizes = [8, 128], strides = [1, 1]} : vector<8x256xf32> to vector<8x128xf32>
    %183 = vector.extract_strided_slice %176 {offsets = [0, 128], sizes = [8, 128], strides = [1, 1]} : vector<8x256xf32> to vector<8x128xf32>
    %184 = arith.addf %182, %183 : vector<8x128xf32>
    %185 = vector.extract_strided_slice %181 {offsets = [0, 0], sizes = [8, 96], strides = [1, 1]} : vector<8x128xf32> to vector<8x96xf32>
    %186 = arith.negf %185 : vector<8x96xf32>
    %187 = math.exp %186 : vector<8x96xf32>
    %cst_44 = arith.constant 1.000000e+00 : f32
    %188 = vector.broadcast %cst_44 : f32 to vector<8x96xf32>
    %189 = arith.addf %188, %187 : vector<8x96xf32>
    %190 = arith.divf %188, %189 : vector<8x96xf32>
    %191 = vector.extract_strided_slice %184 {offsets = [0, 0], sizes = [8, 96], strides = [1, 1]} : vector<8x128xf32> to vector<8x96xf32>
    %192 = arith.negf %191 : vector<8x96xf32>
    %193 = math.exp %192 : vector<8x96xf32>
    %cst_45 = arith.constant 1.000000e+00 : f32
    %194 = vector.broadcast %cst_45 : f32 to vector<8x96xf32>
    %195 = arith.addf %194, %193 : vector<8x96xf32>
    %196 = arith.divf %194, %195 : vector<8x96xf32>
    %197 = vector.extract_strided_slice %181 {offsets = [0, 96], sizes = [8, 32], strides = [1, 1]} : vector<8x128xf32> to vector<8x32xf32>
    %198 = math.tanh %197 : vector<8x32xf32>
    %199 = vector.extract_strided_slice %184 {offsets = [0, 96], sizes = [8, 32], strides = [1, 1]} : vector<8x128xf32> to vector<8x32xf32>
    %200 = math.tanh %199 : vector<8x32xf32>
    %201 = vector.extract_strided_slice %190 {offsets = [0, 32], sizes = [8, 32], strides = [1, 1]} : vector<8x96xf32> to vector<8x32xf32>
    %202 = arith.mulf %201, %152 : vector<8x32xf32>
    %203 = vector.extract_strided_slice %190 {offsets = [0, 0], sizes = [8, 32], strides = [1, 1]} : vector<8x96xf32> to vector<8x32xf32>
    %204 = arith.mulf %203, %198 : vector<8x32xf32>
    %205 = arith.addf %202, %204 : vector<8x32xf32>
    %206 = vector.extract_strided_slice %196 {offsets = [0, 32], sizes = [8, 32], strides = [1, 1]} : vector<8x96xf32> to vector<8x32xf32>
    %207 = arith.mulf %206, %157 : vector<8x32xf32>
    %208 = vector.extract_strided_slice %196 {offsets = [0, 0], sizes = [8, 32], strides = [1, 1]} : vector<8x96xf32> to vector<8x32xf32>
    %209 = arith.mulf %208, %200 : vector<8x32xf32>
    %210 = arith.addf %207, %209 : vector<8x32xf32>
    %211 = vector.extract_strided_slice %190 {offsets = [0, 64], sizes = [8, 32], strides = [1, 1]} : vector<8x96xf32> to vector<8x32xf32>
    %212 = math.tanh %205 : vector<8x32xf32>
    %213 = arith.mulf %211, %212 : vector<8x32xf32>
    %214 = vector.extract_strided_slice %196 {offsets = [0, 64], sizes = [8, 32], strides = [1, 1]} : vector<8x96xf32> to vector<8x32xf32>
    %215 = math.tanh %210 : vector<8x32xf32>
    %216 = arith.mulf %214, %215 : vector<8x32xf32>
    %217 = arith.index_cast %170 : i32 to index
    %c0_46 = arith.constant 0 : index
    %218 = vector.load %arg9[%217, %c0_46] : memref<64x32xf32, #tpu.memory_space<vmem>>, vector<8x32xf32>
    tpu.vector_store %arg9[%217, %c0_46], %213 {strides = array<i32>} : memref<64x32xf32, #tpu.memory_space<vmem>>, vector<8x32xf32>,
    %219 = arith.index_cast %172 : i32 to index
    %c0_47 = arith.constant 0 : index
    %220 = vector.load %arg10[%219, %c0_47] : memref<64x32xf32, #tpu.memory_space<vmem>>, vector<8x32xf32>
    tpu.vector_store %arg10[%219, %c0_47], %216 {strides = array<i32>} : memref<64x32xf32, #tpu.memory_space<vmem>>, vector<8x32xf32>,
    %c4_i32 = arith.constant 4 : i32
    %c7_i32_48 = arith.constant 7 : i32
    %221 = arith.subi %c7_i32_48, %c4_i32 : i32
    %c8_i32_49 = arith.constant 8 : i32
    %222 = arith.muli %c4_i32, %c8_i32_49 : i32
    %223 = tpu.assume_multiple %222, 8 : i32
    %c8_i32_50 = arith.constant 8 : i32
    %224 = arith.muli %221, %c8_i32_50 : i32
    %225 = tpu.assume_multiple %224, 8 : i32
    %226 = arith.index_cast %223 : i32 to index
    %c0_51 = arith.constant 0 : index
    %227 = vector.load %arg8[%226, %c0_51] : memref<64x256xf32, #tpu.memory_space<vmem>>, vector<8x256xf32>
    %228 = arith.index_cast %225 : i32 to index
    %c0_52 = arith.constant 0 : index
    %229 = vector.load %arg8[%228, %c0_52] : memref<64x256xf32, #tpu.memory_space<vmem>>, vector<8x256xf32>
    %230 = tpu.concatenate %213, %216 in 1 : vector<8x32xf32>, vector<8x32xf32> -> vector<8x64xf32>
    %cst_53 = arith.constant dense<0.000000e+00> : vector<8x256xf32>
    %231 = tpu.matmul %230, %7, %cst_53 {dimension_numbers = #tpu.dot_dimension_numbers<[1], [0], [0], [1], [0, 0, 1, 1], [], []>} : vector<8x64xf32>, vector<64x256xf32>, vector<8x256xf32> -> vector<8x256xf32>
    %232 = vector.extract_strided_slice %231 {offsets = [0, 0], sizes = [8, 128], strides = [1, 1]} : vector<8x256xf32> to vector<8x128xf32>
    %233 = vector.extract_strided_slice %227 {offsets = [0, 0], sizes = [8, 128], strides = [1, 1]} : vector<8x256xf32> to vector<8x128xf32>
    %234 = arith.addf %232, %233 : vector<8x128xf32>
    %235 = vector.extract_strided_slice %231 {offsets = [0, 128], sizes = [8, 128], strides = [1, 1]} : vector<8x256xf32> to vector<8x128xf32>
    %236 = vector.extract_strided_slice %229 {offsets = [0, 128], sizes = [8, 128], strides = [1, 1]} : vector<8x256xf32> to vector<8x128xf32>
    %237 = arith.addf %235, %236 : vector<8x128xf32>
    %238 = vector.extract_strided_slice %234 {offsets = [0, 0], sizes = [8, 96], strides = [1, 1]} : vector<8x128xf32> to vector<8x96xf32>
    %239 = arith.negf %238 : vector<8x96xf32>
    %240 = math.exp %239 : vector<8x96xf32>
    %cst_54 = arith.constant 1.000000e+00 : f32
    %241 = vector.broadcast %cst_54 : f32 to vector<8x96xf32>
    %242 = arith.addf %241, %240 : vector<8x96xf32>
    %243 = arith.divf %241, %242 : vector<8x96xf32>
    %244 = vector.extract_strided_slice %237 {offsets = [0, 0], sizes = [8, 96], strides = [1, 1]} : vector<8x128xf32> to vector<8x96xf32>
    %245 = arith.negf %244 : vector<8x96xf32>
    %246 = math.exp %245 : vector<8x96xf32>
    %cst_55 = arith.constant 1.000000e+00 : f32
    %247 = vector.broadcast %cst_55 : f32 to vector<8x96xf32>
    %248 = arith.addf %247, %246 : vector<8x96xf32>
    %249 = arith.divf %247, %248 : vector<8x96xf32>
    %250 = vector.extract_strided_slice %234 {offsets = [0, 96], sizes = [8, 32], strides = [1, 1]} : vector<8x128xf32> to vector<8x32xf32>
    %251 = math.tanh %250 : vector<8x32xf32>
    %252 = vector.extract_strided_slice %237 {offsets = [0, 96], sizes = [8, 32], strides = [1, 1]} : vector<8x128xf32> to vector<8x32xf32>
    %253 = math.tanh %252 : vector<8x32xf32>
    %254 = vector.extract_strided_slice %243 {offsets = [0, 32], sizes = [8, 32], strides = [1, 1]} : vector<8x96xf32> to vector<8x32xf32>
    %255 = arith.mulf %254, %205 : vector<8x32xf32>
    %256 = vector.extract_strided_slice %243 {offsets = [0, 0], sizes = [8, 32], strides = [1, 1]} : vector<8x96xf32> to vector<8x32xf32>
    %257 = arith.mulf %256, %251 : vector<8x32xf32>
    %258 = arith.addf %255, %257 : vector<8x32xf32>
    %259 = vector.extract_strided_slice %249 {offsets = [0, 32], sizes = [8, 32], strides = [1, 1]} : vector<8x96xf32> to vector<8x32xf32>
    %260 = arith.mulf %259, %210 : vector<8x32xf32>
    %261 = vector.extract_strided_slice %249 {offsets = [0, 0], sizes = [8, 32], strides = [1, 1]} : vector<8x96xf32> to vector<8x32xf32>
    %262 = arith.mulf %261, %253 : vector<8x32xf32>
    %263 = arith.addf %260, %262 : vector<8x32xf32>
    %264 = vector.extract_strided_slice %243 {offsets = [0, 64], sizes = [8, 32], strides = [1, 1]} : vector<8x96xf32> to vector<8x32xf32>
    %265 = math.tanh %258 : vector<8x32xf32>
    %266 = arith.mulf %264, %265 : vector<8x32xf32>
    %267 = vector.extract_strided_slice %249 {offsets = [0, 64], sizes = [8, 32], strides = [1, 1]} : vector<8x96xf32> to vector<8x32xf32>
    %268 = math.tanh %263 : vector<8x32xf32>
    %269 = arith.mulf %267, %268 : vector<8x32xf32>
    %270 = arith.index_cast %223 : i32 to index
    %c0_56 = arith.constant 0 : index
    %271 = vector.load %arg9[%270, %c0_56] : memref<64x32xf32, #tpu.memory_space<vmem>>, vector<8x32xf32>
    tpu.vector_store %arg9[%270, %c0_56], %266 {strides = array<i32>} : memref<64x32xf32, #tpu.memory_space<vmem>>, vector<8x32xf32>,
    %272 = arith.index_cast %225 : i32 to index
    %c0_57 = arith.constant 0 : index
    %273 = vector.load %arg10[%272, %c0_57] : memref<64x32xf32, #tpu.memory_space<vmem>>, vector<8x32xf32>
    tpu.vector_store %arg10[%272, %c0_57], %269 {strides = array<i32>} : memref<64x32xf32, #tpu.memory_space<vmem>>, vector<8x32xf32>,
    %c5_i32 = arith.constant 5 : i32
    %c7_i32_58 = arith.constant 7 : i32
    %274 = arith.subi %c7_i32_58, %c5_i32 : i32
    %c8_i32_59 = arith.constant 8 : i32
    %275 = arith.muli %c5_i32, %c8_i32_59 : i32
    %276 = tpu.assume_multiple %275, 8 : i32
    %c8_i32_60 = arith.constant 8 : i32
    %277 = arith.muli %274, %c8_i32_60 : i32
    %278 = tpu.assume_multiple %277, 8 : i32
    %279 = arith.index_cast %276 : i32 to index
    %c0_61 = arith.constant 0 : index
    %280 = vector.load %arg8[%279, %c0_61] : memref<64x256xf32, #tpu.memory_space<vmem>>, vector<8x256xf32>
    %281 = arith.index_cast %278 : i32 to index
    %c0_62 = arith.constant 0 : index
    %282 = vector.load %arg8[%281, %c0_62] : memref<64x256xf32, #tpu.memory_space<vmem>>, vector<8x256xf32>
    %283 = tpu.concatenate %266, %269 in 1 : vector<8x32xf32>, vector<8x32xf32> -> vector<8x64xf32>
    %cst_63 = arith.constant dense<0.000000e+00> : vector<8x256xf32>
    %284 = tpu.matmul %283, %7, %cst_63 {dimension_numbers = #tpu.dot_dimension_numbers<[1], [0], [0], [1], [0, 0, 1, 1], [], []>} : vector<8x64xf32>, vector<64x256xf32>, vector<8x256xf32> -> vector<8x256xf32>
    %285 = vector.extract_strided_slice %284 {offsets = [0, 0], sizes = [8, 128], strides = [1, 1]} : vector<8x256xf32> to vector<8x128xf32>
    %286 = vector.extract_strided_slice %280 {offsets = [0, 0], sizes = [8, 128], strides = [1, 1]} : vector<8x256xf32> to vector<8x128xf32>
    %287 = arith.addf %285, %286 : vector<8x128xf32>
    %288 = vector.extract_strided_slice %284 {offsets = [0, 128], sizes = [8, 128], strides = [1, 1]} : vector<8x256xf32> to vector<8x128xf32>
    %289 = vector.extract_strided_slice %282 {offsets = [0, 128], sizes = [8, 128], strides = [1, 1]} : vector<8x256xf32> to vector<8x128xf32>
    %290 = arith.addf %288, %289 : vector<8x128xf32>
    %291 = vector.extract_strided_slice %287 {offsets = [0, 0], sizes = [8, 96], strides = [1, 1]} : vector<8x128xf32> to vector<8x96xf32>
    %292 = arith.negf %291 : vector<8x96xf32>
    %293 = math.exp %292 : vector<8x96xf32>
    %cst_64 = arith.constant 1.000000e+00 : f32
    %294 = vector.broadcast %cst_64 : f32 to vector<8x96xf32>
    %295 = arith.addf %294, %293 : vector<8x96xf32>
    %296 = arith.divf %294, %295 : vector<8x96xf32>
    %297 = vector.extract_strided_slice %290 {offsets = [0, 0], sizes = [8, 96], strides = [1, 1]} : vector<8x128xf32> to vector<8x96xf32>
    %298 = arith.negf %297 : vector<8x96xf32>
    %299 = math.exp %298 : vector<8x96xf32>
    %cst_65 = arith.constant 1.000000e+00 : f32
    %300 = vector.broadcast %cst_65 : f32 to vector<8x96xf32>
    %301 = arith.addf %300, %299 : vector<8x96xf32>
    %302 = arith.divf %300, %301 : vector<8x96xf32>
    %303 = vector.extract_strided_slice %287 {offsets = [0, 96], sizes = [8, 32], strides = [1, 1]} : vector<8x128xf32> to vector<8x32xf32>
    %304 = math.tanh %303 : vector<8x32xf32>
    %305 = vector.extract_strided_slice %290 {offsets = [0, 96], sizes = [8, 32], strides = [1, 1]} : vector<8x128xf32> to vector<8x32xf32>
    %306 = math.tanh %305 : vector<8x32xf32>
    %307 = vector.extract_strided_slice %296 {offsets = [0, 32], sizes = [8, 32], strides = [1, 1]} : vector<8x96xf32> to vector<8x32xf32>
    %308 = arith.mulf %307, %258 : vector<8x32xf32>
    %309 = vector.extract_strided_slice %296 {offsets = [0, 0], sizes = [8, 32], strides = [1, 1]} : vector<8x96xf32> to vector<8x32xf32>
    %310 = arith.mulf %309, %304 : vector<8x32xf32>
    %311 = arith.addf %308, %310 : vector<8x32xf32>
    %312 = vector.extract_strided_slice %302 {offsets = [0, 32], sizes = [8, 32], strides = [1, 1]} : vector<8x96xf32> to vector<8x32xf32>
    %313 = arith.mulf %312, %263 : vector<8x32xf32>
    %314 = vector.extract_strided_slice %302 {offsets = [0, 0], sizes = [8, 32], strides = [1, 1]} : vector<8x96xf32> to vector<8x32xf32>
    %315 = arith.mulf %314, %306 : vector<8x32xf32>
    %316 = arith.addf %313, %315 : vector<8x32xf32>
    %317 = vector.extract_strided_slice %296 {offsets = [0, 64], sizes = [8, 32], strides = [1, 1]} : vector<8x96xf32> to vector<8x32xf32>
    %318 = math.tanh %311 : vector<8x32xf32>
    %319 = arith.mulf %317, %318 : vector<8x32xf32>
    %320 = vector.extract_strided_slice %302 {offsets = [0, 64], sizes = [8, 32], strides = [1, 1]} : vector<8x96xf32> to vector<8x32xf32>
    %321 = math.tanh %316 : vector<8x32xf32>
    %322 = arith.mulf %320, %321 : vector<8x32xf32>
    %323 = arith.index_cast %276 : i32 to index
    %c0_66 = arith.constant 0 : index
    %324 = vector.load %arg9[%323, %c0_66] : memref<64x32xf32, #tpu.memory_space<vmem>>, vector<8x32xf32>
    tpu.vector_store %arg9[%323, %c0_66], %319 {strides = array<i32>} : memref<64x32xf32, #tpu.memory_space<vmem>>, vector<8x32xf32>,
    %325 = arith.index_cast %278 : i32 to index
    %c0_67 = arith.constant 0 : index
    %326 = vector.load %arg10[%325, %c0_67] : memref<64x32xf32, #tpu.memory_space<vmem>>, vector<8x32xf32>
    tpu.vector_store %arg10[%325, %c0_67], %322 {strides = array<i32>} : memref<64x32xf32, #tpu.memory_space<vmem>>, vector<8x32xf32>,
    %c6_i32 = arith.constant 6 : i32
    %c7_i32_68 = arith.constant 7 : i32
    %327 = arith.subi %c7_i32_68, %c6_i32 : i32
    %c8_i32_69 = arith.constant 8 : i32
    %328 = arith.muli %c6_i32, %c8_i32_69 : i32
    %329 = tpu.assume_multiple %328, 8 : i32
    %c8_i32_70 = arith.constant 8 : i32
    %330 = arith.muli %327, %c8_i32_70 : i32
    %331 = tpu.assume_multiple %330, 8 : i32
    %332 = arith.index_cast %329 : i32 to index
    %c0_71 = arith.constant 0 : index
    %333 = vector.load %arg8[%332, %c0_71] : memref<64x256xf32, #tpu.memory_space<vmem>>, vector<8x256xf32>
    %334 = arith.index_cast %331 : i32 to index
    %c0_72 = arith.constant 0 : index
    %335 = vector.load %arg8[%334, %c0_72] : memref<64x256xf32, #tpu.memory_space<vmem>>, vector<8x256xf32>
    %336 = tpu.concatenate %319, %322 in 1 : vector<8x32xf32>, vector<8x32xf32> -> vector<8x64xf32>
    %cst_73 = arith.constant dense<0.000000e+00> : vector<8x256xf32>
    %337 = tpu.matmul %336, %7, %cst_73 {dimension_numbers = #tpu.dot_dimension_numbers<[1], [0], [0], [1], [0, 0, 1, 1], [], []>} : vector<8x64xf32>, vector<64x256xf32>, vector<8x256xf32> -> vector<8x256xf32>
    %338 = vector.extract_strided_slice %337 {offsets = [0, 0], sizes = [8, 128], strides = [1, 1]} : vector<8x256xf32> to vector<8x128xf32>
    %339 = vector.extract_strided_slice %333 {offsets = [0, 0], sizes = [8, 128], strides = [1, 1]} : vector<8x256xf32> to vector<8x128xf32>
    %340 = arith.addf %338, %339 : vector<8x128xf32>
    %341 = vector.extract_strided_slice %337 {offsets = [0, 128], sizes = [8, 128], strides = [1, 1]} : vector<8x256xf32> to vector<8x128xf32>
    %342 = vector.extract_strided_slice %335 {offsets = [0, 128], sizes = [8, 128], strides = [1, 1]} : vector<8x256xf32> to vector<8x128xf32>
    %343 = arith.addf %341, %342 : vector<8x128xf32>
    %344 = vector.extract_strided_slice %340 {offsets = [0, 0], sizes = [8, 96], strides = [1, 1]} : vector<8x128xf32> to vector<8x96xf32>
    %345 = arith.negf %344 : vector<8x96xf32>
    %346 = math.exp %345 : vector<8x96xf32>
    %cst_74 = arith.constant 1.000000e+00 : f32
    %347 = vector.broadcast %cst_74 : f32 to vector<8x96xf32>
    %348 = arith.addf %347, %346 : vector<8x96xf32>
    %349 = arith.divf %347, %348 : vector<8x96xf32>
    %350 = vector.extract_strided_slice %343 {offsets = [0, 0], sizes = [8, 96], strides = [1, 1]} : vector<8x128xf32> to vector<8x96xf32>
    %351 = arith.negf %350 : vector<8x96xf32>
    %352 = math.exp %351 : vector<8x96xf32>
    %cst_75 = arith.constant 1.000000e+00 : f32
    %353 = vector.broadcast %cst_75 : f32 to vector<8x96xf32>
    %354 = arith.addf %353, %352 : vector<8x96xf32>
    %355 = arith.divf %353, %354 : vector<8x96xf32>
    %356 = vector.extract_strided_slice %340 {offsets = [0, 96], sizes = [8, 32], strides = [1, 1]} : vector<8x128xf32> to vector<8x32xf32>
    %357 = math.tanh %356 : vector<8x32xf32>
    %358 = vector.extract_strided_slice %343 {offsets = [0, 96], sizes = [8, 32], strides = [1, 1]} : vector<8x128xf32> to vector<8x32xf32>
    %359 = math.tanh %358 : vector<8x32xf32>
    %360 = vector.extract_strided_slice %349 {offsets = [0, 32], sizes = [8, 32], strides = [1, 1]} : vector<8x96xf32> to vector<8x32xf32>
    %361 = arith.mulf %360, %311 : vector<8x32xf32>
    %362 = vector.extract_strided_slice %349 {offsets = [0, 0], sizes = [8, 32], strides = [1, 1]} : vector<8x96xf32> to vector<8x32xf32>
    %363 = arith.mulf %362, %357 : vector<8x32xf32>
    %364 = arith.addf %361, %363 : vector<8x32xf32>
    %365 = vector.extract_strided_slice %355 {offsets = [0, 32], sizes = [8, 32], strides = [1, 1]} : vector<8x96xf32> to vector<8x32xf32>
    %366 = arith.mulf %365, %316 : vector<8x32xf32>
    %367 = vector.extract_strided_slice %355 {offsets = [0, 0], sizes = [8, 32], strides = [1, 1]} : vector<8x96xf32> to vector<8x32xf32>
    %368 = arith.mulf %367, %359 : vector<8x32xf32>
    %369 = arith.addf %366, %368 : vector<8x32xf32>
    %370 = vector.extract_strided_slice %349 {offsets = [0, 64], sizes = [8, 32], strides = [1, 1]} : vector<8x96xf32> to vector<8x32xf32>
    %371 = math.tanh %364 : vector<8x32xf32>
    %372 = arith.mulf %370, %371 : vector<8x32xf32>
    %373 = vector.extract_strided_slice %355 {offsets = [0, 64], sizes = [8, 32], strides = [1, 1]} : vector<8x96xf32> to vector<8x32xf32>
    %374 = math.tanh %369 : vector<8x32xf32>
    %375 = arith.mulf %373, %374 : vector<8x32xf32>
    %376 = arith.index_cast %329 : i32 to index
    %c0_76 = arith.constant 0 : index
    %377 = vector.load %arg9[%376, %c0_76] : memref<64x32xf32, #tpu.memory_space<vmem>>, vector<8x32xf32>
    tpu.vector_store %arg9[%376, %c0_76], %372 {strides = array<i32>} : memref<64x32xf32, #tpu.memory_space<vmem>>, vector<8x32xf32>,
    %378 = arith.index_cast %331 : i32 to index
    %c0_77 = arith.constant 0 : index
    %379 = vector.load %arg10[%378, %c0_77] : memref<64x32xf32, #tpu.memory_space<vmem>>, vector<8x32xf32>
    tpu.vector_store %arg10[%378, %c0_77], %375 {strides = array<i32>} : memref<64x32xf32, #tpu.memory_space<vmem>>, vector<8x32xf32>,
    %c7_i32_78 = arith.constant 7 : i32
    %c7_i32_79 = arith.constant 7 : i32
    %380 = arith.subi %c7_i32_79, %c7_i32_78 : i32
    %c8_i32_80 = arith.constant 8 : i32
    %381 = arith.muli %c7_i32_78, %c8_i32_80 : i32
    %382 = tpu.assume_multiple %381, 8 : i32
    %c8_i32_81 = arith.constant 8 : i32
    %383 = arith.muli %380, %c8_i32_81 : i32
    %384 = tpu.assume_multiple %383, 8 : i32
    %385 = arith.index_cast %382 : i32 to index
    %c0_82 = arith.constant 0 : index
    %386 = vector.load %arg8[%385, %c0_82] : memref<64x256xf32, #tpu.memory_space<vmem>>, vector<8x256xf32>
    %387 = arith.index_cast %384 : i32 to index
    %c0_83 = arith.constant 0 : index
    %388 = vector.load %arg8[%387, %c0_83] : memref<64x256xf32, #tpu.memory_space<vmem>>, vector<8x256xf32>
    %389 = tpu.concatenate %372, %375 in 1 : vector<8x32xf32>, vector<8x32xf32> -> vector<8x64xf32>
    %cst_84 = arith.constant dense<0.000000e+00> : vector<8x256xf32>
    %390 = tpu.matmul %389, %7, %cst_84 {dimension_numbers = #tpu.dot_dimension_numbers<[1], [0], [0], [1], [0, 0, 1, 1], [], []>} : vector<8x64xf32>, vector<64x256xf32>, vector<8x256xf32> -> vector<8x256xf32>
    %391 = vector.extract_strided_slice %390 {offsets = [0, 0], sizes = [8, 128], strides = [1, 1]} : vector<8x256xf32> to vector<8x128xf32>
    %392 = vector.extract_strided_slice %386 {offsets = [0, 0], sizes = [8, 128], strides = [1, 1]} : vector<8x256xf32> to vector<8x128xf32>
    %393 = arith.addf %391, %392 : vector<8x128xf32>
    %394 = vector.extract_strided_slice %390 {offsets = [0, 128], sizes = [8, 128], strides = [1, 1]} : vector<8x256xf32> to vector<8x128xf32>
    %395 = vector.extract_strided_slice %388 {offsets = [0, 128], sizes = [8, 128], strides = [1, 1]} : vector<8x256xf32> to vector<8x128xf32>
    %396 = arith.addf %394, %395 : vector<8x128xf32>
    %397 = vector.extract_strided_slice %393 {offsets = [0, 0], sizes = [8, 96], strides = [1, 1]} : vector<8x128xf32> to vector<8x96xf32>
    %398 = arith.negf %397 : vector<8x96xf32>
    %399 = math.exp %398 : vector<8x96xf32>
    %cst_85 = arith.constant 1.000000e+00 : f32
    %400 = vector.broadcast %cst_85 : f32 to vector<8x96xf32>
    %401 = arith.addf %400, %399 : vector<8x96xf32>
    %402 = arith.divf %400, %401 : vector<8x96xf32>
    %403 = vector.extract_strided_slice %396 {offsets = [0, 0], sizes = [8, 96], strides = [1, 1]} : vector<8x128xf32> to vector<8x96xf32>
    %404 = arith.negf %403 : vector<8x96xf32>
    %405 = math.exp %404 : vector<8x96xf32>
    %cst_86 = arith.constant 1.000000e+00 : f32
    %406 = vector.broadcast %cst_86 : f32 to vector<8x96xf32>
    %407 = arith.addf %406, %405 : vector<8x96xf32>
    %408 = arith.divf %406, %407 : vector<8x96xf32>
    %409 = vector.extract_strided_slice %393 {offsets = [0, 96], sizes = [8, 32], strides = [1, 1]} : vector<8x128xf32> to vector<8x32xf32>
    %410 = math.tanh %409 : vector<8x32xf32>
    %411 = vector.extract_strided_slice %396 {offsets = [0, 96], sizes = [8, 32], strides = [1, 1]} : vector<8x128xf32> to vector<8x32xf32>
    %412 = math.tanh %411 : vector<8x32xf32>
    %413 = vector.extract_strided_slice %402 {offsets = [0, 32], sizes = [8, 32], strides = [1, 1]} : vector<8x96xf32> to vector<8x32xf32>
    %414 = arith.mulf %413, %364 : vector<8x32xf32>
    %415 = vector.extract_strided_slice %402 {offsets = [0, 0], sizes = [8, 32], strides = [1, 1]} : vector<8x96xf32> to vector<8x32xf32>
    %416 = arith.mulf %415, %410 : vector<8x32xf32>
    %417 = arith.addf %414, %416 : vector<8x32xf32>
    %418 = vector.extract_strided_slice %408 {offsets = [0, 32], sizes = [8, 32], strides = [1, 1]} : vector<8x96xf32> to vector<8x32xf32>
    %419 = arith.mulf %418, %369 : vector<8x32xf32>
    %420 = vector.extract_strided_slice %408 {offsets = [0, 0], sizes = [8, 32], strides = [1, 1]} : vector<8x96xf32> to vector<8x32xf32>
    %421 = arith.mulf %420, %412 : vector<8x32xf32>
    %422 = arith.addf %419, %421 : vector<8x32xf32>
    %423 = vector.extract_strided_slice %402 {offsets = [0, 64], sizes = [8, 32], strides = [1, 1]} : vector<8x96xf32> to vector<8x32xf32>
    %424 = math.tanh %417 : vector<8x32xf32>
    %425 = arith.mulf %423, %424 : vector<8x32xf32>
    %426 = vector.extract_strided_slice %408 {offsets = [0, 64], sizes = [8, 32], strides = [1, 1]} : vector<8x96xf32> to vector<8x32xf32>
    %427 = math.tanh %422 : vector<8x32xf32>
    %428 = arith.mulf %426, %427 : vector<8x32xf32>
    %429 = arith.index_cast %382 : i32 to index
    %c0_87 = arith.constant 0 : index
    %430 = vector.load %arg9[%429, %c0_87] : memref<64x32xf32, #tpu.memory_space<vmem>>, vector<8x32xf32>
    tpu.vector_store %arg9[%429, %c0_87], %425 {strides = array<i32>} : memref<64x32xf32, #tpu.memory_space<vmem>>, vector<8x32xf32>,
    %431 = arith.index_cast %384 : i32 to index
    %c0_88 = arith.constant 0 : index
    %432 = vector.load %arg10[%431, %c0_88] : memref<64x32xf32, #tpu.memory_space<vmem>>, vector<8x32xf32>
    tpu.vector_store %arg10[%431, %c0_88], %428 {strides = array<i32>} : memref<64x32xf32, #tpu.memory_space<vmem>>, vector<8x32xf32>,
    %c8_i32_89 = arith.constant 8 : i32
    %c0_90 = arith.constant 0 : index
    %c0_91 = arith.constant 0 : index
    %433 = vector.load %arg9[%c0_90, %c0_91] : memref<64x32xf32, #tpu.memory_space<vmem>>, vector<64x32xf32>
    %c0_92 = arith.constant 0 : index
    %c0_93 = arith.constant 0 : index
    %434 = vector.load %arg10[%c0_92, %c0_93] : memref<64x32xf32, #tpu.memory_space<vmem>>, vector<64x32xf32>
    %435 = tpu.concatenate %433, %434 in 1 : vector<64x32xf32>, vector<64x32xf32> -> vector<64x64xf32>
    %c0_94 = arith.constant 0 : index
    %c0_95 = arith.constant 0 : index
    %436 = vector.load %arg5[%c0_94, %c0_95] : memref<64x128xf32, #tpu.memory_space<vmem>>, vector<64x128xf32>
    %cst_96 = arith.constant dense<0.000000e+00> : vector<64x128xf32>
    %437 = tpu.matmul %435, %436, %cst_96 {dimension_numbers = #tpu.dot_dimension_numbers<[1], [0], [0], [1], [0, 0, 1, 1], [], []>} : vector<64x64xf32>, vector<64x128xf32>, vector<64x128xf32> -> vector<64x128xf32>
    %c0_97 = arith.constant 0 : index
    %c0_98 = arith.constant 0 : index
    %438 = vector.load %arg6[%c0_97, %c0_98] : memref<1x128xf32, #tpu.memory_space<vmem>>, vector<1x128xf32>
    %439 = vector.broadcast %438 : vector<1x128xf32> to vector<64x128xf32>
    %440 = arith.addf %437, %439 : vector<64x128xf32>
    %c0_99 = arith.constant 0 : index
    %c0_100 = arith.constant 0 : index
    %441 = vector.load %arg7[%c0_99, %c0_100] : memref<64x128xf32, #tpu.memory_space<vmem>>, vector<64x128xf32>
    tpu.vector_store %arg7[%c0_99, %c0_100], %440 {strides = array<i32>} : memref<64x128xf32, #tpu.memory_space<vmem>>, vector<64x128xf32>,
    return
  }
  func.func @transform_0(%arg0: i32) -> (i32, i32) {
    %c0_i32 = arith.constant 0 : i32
    %c0_i32_0 = arith.constant 0 : i32
    %c0_i32_1 = arith.constant 0 : i32
    return %c0_i32, %c0_i32_0 : i32, i32
  }
  func.func @transform_1(%arg0: i32) -> (i32, i32) {
    %c0_i32 = arith.constant 0 : i32
    %c0_i32_0 = arith.constant 0 : i32
    %c0_i32_1 = arith.constant 0 : i32
    return %c0_i32, %c0_i32_0 : i32, i32
  }
  func.func @transform_2(%arg0: i32) -> (i32, i32) {
    %c0_i32 = arith.constant 0 : i32
    %c0_i32_0 = arith.constant 0 : i32
    %c0_i32_1 = arith.constant 0 : i32
    return %c0_i32, %c0_i32_0 : i32, i32
  }
  func.func @transform_3(%arg0: i32) -> (i32, i32) {
    %c0_i32 = arith.constant 0 : i32
    %c0_i32_0 = arith.constant 0 : i32
    %c0_i32_1 = arith.constant 0 : i32
    return %c0_i32, %c0_i32_0 : i32, i32
  }
  func.func @transform_4(%arg0: i32) -> (i32, i32) {
    %c0_i32 = arith.constant 0 : i32
    %c0_i32_0 = arith.constant 0 : i32
    %c0_i32_1 = arith.constant 0 : i32
    return %c0_i32, %c0_i32_0 : i32, i32
  }
  func.func @transform_5(%arg0: i32) -> (i32, i32) {
    %c0_i32 = arith.constant 0 : i32
    %c0_i32_0 = arith.constant 0 : i32
    %c0_i32_1 = arith.constant 0 : i32
    return %c0_i32, %c0_i32_0 : i32, i32
  }
  func.func @transform_6(%arg0: i32) -> (i32, i32) {
    %c0_i32 = arith.constant 0 : i32
    %c0_i32_0 = arith.constant 0 : i32
    %c0_i32_1 = arith.constant 0 : i32
    return %c0_i32, %c0_i32_0 : i32, i32
  }
}

</mosaic_0001>

<bundles_post_ra>
// kernel: tpu_custom_call.1
= control target key start
LH: loop header
LB: loop body
LE: loop exit
PB: predicated region body
PF: predicated region fallthrough
CT: control target
= control target key end

     0   :  { %11 = vsyncpa [#allocation6], 0  ;;  %s2547_s0 = inlined_call_operand.vmem [shape: f32[64,16], index: 0, kind: input, shape index: {}]   ;;  %s2548_s1 = inlined_call_operand.hbm [shape: f32[16,256], index: 1, kind: input, shape index: {}]   ;;  %s2549_s2 = inlined_call_operand.vmem [shape: f32[1,256], index: 2, kind: input, shape index: {}]   ;;  %s2550_s3 = inlined_call_operand.hbm [shape: f32[64,256], index: 3, kind: input, shape index: {}]   ;;  %s2551_s4 = inlined_call_operand.vmem [shape: f32[64,128], index: 4, kind: input, shape index: {}]   ;;  %s2552_s5 = inlined_call_operand.vmem [shape: f32[1,128], index: 5, kind: input, shape index: {}]   ;;  %s2553_s6 = inlined_call_operand.hbm [shape: f32[64,128], index: 6, kind: output, shape index: {}]  }
   0x1   :  { %12 = vsyncpa [#allocation9], 0 }
   0x2   :  { %13 = vsyncpa [#allocation7], 0  ;;  %s2080_s21 = smov [#allocation5]   ;;  %s2008_s25 = scalar_lea.hbm %s2548_s1, 512 }
   0x3   :  { %s21_s22 = sshll.u32 %s2080_s21, 4  ;;  %p2009_p0 = scmp.ne.s32.totalorder %s2548_s1, %s2008_s25  ;;  %s22_s22 = int_to_ptr.vmem [resolvable:$true] %s21_s22 }
   0x4   :  { %p2012_p1 = scmp.lt.u32.totalorder %s2008_s25, %s2548_s1 }
   0x6   :  { %p2014_p2 = pnand %p2012_p1, %p2009_p0 }
   0x8   :  { %2017 = shalt.err (!%p2014_p2)
}
   0x9   :  { %s2018_s30 = scalar_lea.vmem %s22_s22, 512  ;;  %p2023_p4 = scmp.lt.s32.totalorder %s22_s22, %s22_s22 }
   0xa   :  { %p2019_p3 = scmp.ne.s32.totalorder %s22_s22, %s2018_s30  ;;  %p2024_p5 = scmp.lt.s32.totalorder %s2018_s30, %s2018_s30 }
   0xc   :  { %p2025_p6 = por %p2024_p5, %p2023_p4 }
   0xe   :  { %p2026_p7 = pnand %p2025_p6, %p2019_p3 }
  0x10   :  { %2029 = shalt.err (!%p2026_p7)
}
  0x11   :  { %s2081_s7 = smov 256   ;;  %s2082_s8 = smov 16  }
  0x12   :  { %27 = dma.hbm_to_vmem [thread:$0]  %s2548_s1, 512, %s22_s22, [#allocation6], %s2081_s7, %s2081_s7, %s2082_s8  }
  0x13   :  { %s2083_s11 = smov [#allocation8]   ;;  %s2030_s15 = scalar_lea.hbm %s2550_s3, 2048 }
  0x14   :  { %s35_s12 = sshll.u32 %s2083_s11, 4  ;;  %p2031_p8 = scmp.ne.s32.totalorder %s2550_s3, %s2030_s15  ;;  %s36_s12 = int_to_ptr.vmem [resolvable:$true] %s35_s12 }
  0x15   :  { %p2034_p9 = scmp.lt.u32.totalorder %s2030_s15, %s2550_s3 }
  0x17   :  { %p2036_p10 = pnand %p2034_p9, %p2031_p8 }
  0x19   :  { %2039 = shalt.err (!%p2036_p10)
}
  0x1a   :  { %s2040_s20 = scalar_lea.vmem %s36_s12, 2048  ;;  %p2045_p12 = scmp.lt.s32.totalorder %s36_s12, %s36_s12 }
  0x1b   :  { %p2041_p11 = scmp.ne.s32.totalorder %s36_s12, %s2040_s20  ;;  %p2046_p13 = scmp.lt.s32.totalorder %s2040_s20, %s2040_s20 }
  0x1d   :  { %p2047_p0 = por %p2046_p13, %p2045_p12 }
  0x1f   :  { %p2048_p1 = pnand %p2047_p0, %p2041_p11 }
  0x21   :  { %2051 = shalt.err (!%p2048_p1)
}
  0x22   :  { %41 = dma.hbm_to_vmem [thread:$0]  %s2550_s3, 2048, %s36_s12, [#allocation9], %s2081_s7, %s2081_s7, %s2082_s8  }
  0x23   :  { %2074 = dma.done.wait [#allocation6], 512  }
  0x24   :  { %2075 = vsyncadd [#allocation6], 4294966784 }
  0x25   :  { %2076 = dma.done.wait [#allocation9], 2048  }
  0x26   :  { %2077 = vsyncadd [#allocation9], 4294965248  ;;  %v2084_v0 = vmov 0.0   ;;  %v61_v1 = vld [vmem:[#allocation5 + $0x8] sm:$0xff]  ;;  %v63_v2 = vld [vmem:[#allocation5 + $0x18] sm:$0xff]  ;;  %vm76_vm0 = vcmask 130048   ;;  %v66_v36 = vlaneseq }
  0x27   :  { %189 = vmatprep.mubr.f32.mxu1 %v2084_v0  ;;  %165 = vmatprep.mubr.f32.mxu0 %v2084_v0  ;;  %v60_v3 = vld [vmem:[#allocation5] sm:$0xff]  ;;  %v1719_v4 = vpack.c.bf16 %v63_v2, %v61_v1  ;;  %v62_v5 = vld [vmem:[#allocation5 + $0x10] sm:$0xff]  ;;  %v231_v6 = vld [vmem:[#allocation8 + $0x8] sm:$0xff]  ;;  %s2086_s11 = smov 64   ;;  %s2087_s12 = smov 96   ;;  %vm383_vm1 = vcmask 261120  }
  0x28   :  { %v1721_v7 = vpack.c.bf16 %v62_v5, %v60_v3  ;;  %v233_v8 = vld [vmem:[#allocation8 + $0x18] sm:$0xff]  ;;  %v230_v9 = vld [vmem:[#allocation8] sm:$0xff]  ;;  %v232_v10 = vld [vmem:[#allocation8 + $0x10] sm:$0xff]  ;;  %v67_v40 = vshrl.u32 %v66_v36, 7  ;;  %vm254_vm2 = vcmask 523264   ;;  %s2088_s7 = smov [#allocation10]  }
  0x29   :  { %1867 = vmatprep.subr.bf16.mxu1 %v1719_v4  ;;  %v2152_v11 = vpack.c.bf16 %v233_v8, %v231_v6  ;;  %v235_v12 = vld [vmem:[#allocation8 + $0x28] sm:$0xff]  ;;  %v237_v13 = vld [vmem:[#allocation8 + $0x38] sm:$0xff]  ;;  %1720 = vmatprep.subr.bf16.mxu0 %v1719_v4  ;;  %v56_v14 = vld [vmem:[%s2547_s0 + $0x20] sm:$0xff]  ;;  %v2157_v15 = vpack.c.bf16 %v232_v10, %v230_v9  ;;  %s1615_s8 = sshll.u32 %s2088_s7, 4  ;;  %s1616_s8 = int_to_ptr.vmem [resolvable:$true] %s1615_s8 }
  0x2a   :  { %1868 = vmatpush1.bf16.msra.mxu1 %v1721_v7  ;;  %1722 = vmatpush1.bf16.msra.mxu0 %v1721_v7  ;;  %v2160_v16 = vpack.c.bf16 %v237_v13, %v235_v12  ;;  %v234_v17 = vld [vmem:[#allocation8 + $0x20] sm:$0xff]  ;;  %v236_v18 = vld [vmem:[#allocation8 + $0x30] sm:$0xff]  ;;  %v239_v19 = vld [vmem:[#allocation8 + $0x48] sm:$0xff]  ;;  %v68_v44 = vsub.s32 0, %v67_v40  ;;  %v72_v48 = vsub.s32 1, %v67_v40  ;;  %p2057_p3 = scmp.lt.s32.totalorder %s1616_s8, %s1616_s8 }
  0x2b   :  { %1724 = vmatprep.subr.bf16.mxu1 %v2152_v11  ;;  %1756 = vmatprep.subr.bf16.mxu0 %v2152_v11  ;;  %v241_v20 = vld [vmem:[#allocation8 + $0x58] sm:$0xff]  ;;  %v57_v21 = vld [vmem:[%s2547_s0 + $0x28] sm:$0xff]  ;;  %v2169_v22 = vpack.c.bf16 %v236_v18, %v234_v17  ;;  %v52_v23 = vld [vmem:[%s2547_s0] sm:$0xff] }
  0x2c   :  { %v2175_v24 = vpack.c.bf16 %v241_v20, %v239_v19  ;;  %v238_v25 = vld [vmem:[#allocation8 + $0x40] sm:$0xff]  ;;  %v240_v26 = vld [vmem:[#allocation8 + $0x50] sm:$0xff]  ;;  %v243_v27 = vld [vmem:[#allocation8 + $0x68] sm:$0xff] }
  0x2d   :  { %1639 = vmatmul.mubr.msk.f32.vlgmr.msra.gmra.mrb[0].mxu1 %vm76_vm0, %v56_v14  ;;  %1635 = vmatmul.mubr.msk.f32.vlgmr.msra.gmra.mrb[0].mxu0 %vm76_vm0, %v52_v23  ;;  %v245_v28 = vld [vmem:[#allocation8 + $0x78] sm:$0xff]  ;;  %v58_v29 = vld [vmem:[%s2547_s0 + $0x30] sm:$0xff]  ;;  %v2187_v30 = vpack.c.bf16 %v240_v26, %v238_v25  ;;  %v242_v32 = vld [vmem:[#allocation8 + $0x60] sm:$0xff] }
  0x2e   :  { %1726 = vmatpush1.bf16.msra.mxu1 %v2157_v15  ;;  %195 = vmatprep.mubr.f32.mxu1 %v2084_v0  ;;  %v2190_v31 = vpack.c.bf16 %v245_v28, %v243_v27  ;;  %v244_v33 = vld [vmem:[#allocation8 + $0x70] sm:$0xff]  ;;  %v59_v34 = vld [vmem:[%s2547_s0 + $0x38] sm:$0xff]  ;;  %v64_v45 = vld [vmem:[%s2549_s2] sm:$0x3]  ;;  %s2085_s2 = smov 32  }
  0x2f   :  { %1728 = vmatprep.subr.bf16.mxu1 %v2160_v16  ;;  %171 = vmatprep.mubr.f32.mxu0 %v2084_v0  ;;  %v2200_v35 = vpack.c.bf16 %v244_v33, %v242_v32  ;;  %v2238_v49 = vrot.slane %v64_v45, %v68_v44  ;;  %v2243_v53 = vrot.slane %v64_v45, %v72_v48 }
  0x30   :  { %1758 = vmatpush1.bf16.msra.mxu0 %v2157_v15 }
  0x31   :  { %1640 = vmatmul.mubr.msk.f32.gmra.mrb[2].mxu1 %vm76_vm0, %v57_v21  ;;  %1760 = vmatprep.subr.bf16.mxu0 %v2160_v16  ;;  %v53_v21 = vld [vmem:[%s2547_s0 + $0x8] sm:$0xff] }
  0x32   :  { %1730 = vmatpush1.bf16.msra.mxu1 %v2169_v22  ;;  %201 = vmatprep.mubr.f32.mxu1 %v2084_v0 }
  0x33   :  { %1732 = vmatprep.subr.bf16.mxu1 %v2175_v24  ;;  %1636 = vmatmul.mubr.msk.f32.gmra.mrb[2].mxu0 %vm76_vm0, %v53_v21 }
  0x34   :  { %1762 = vmatpush1.bf16.msra.mxu0 %v2169_v22  ;;  %177 = vmatprep.mubr.f32.mxu0 %v2084_v0 }
  0x35   :  { %1641 = vmatmul.mubr.msk.f32.gmra.mrb[4].mxu1 %vm76_vm0, %v58_v29  ;;  %1764 = vmatprep.subr.bf16.mxu0 %v2175_v24 }
  0x36   :  { %1734 = vmatpush1.bf16.msra.mxu1 %v2187_v30  ;;  %207 = vmatprep.mubr.f32.mxu1 %v2084_v0 }
  0x37   :  { %1736 = vmatprep.subr.bf16.mxu1 %v2190_v31 }
  0x38   :  { %1766 = vmatpush1.bf16.msra.mxu0 %v2187_v30 }
  0x39   :  { %1642 = vmatmul.mubr.msk.f32.gmra.mrb[6].mxu1 %vm76_vm0, %v59_v34  ;;  %1768 = vmatprep.subr.bf16.mxu0 %v2190_v31 }
  0x3a   :  { %1738 = vmatpush1.bf16.msra.mxu1 %v2200_v35  ;;  %322 = vmatprep.mubr.f32.mxu1 %v2084_v0 }
  0x3b   :  { %1740 = vmatprep.subr.bf16.mxu1 %v2152_v11 }
  0x3c   :  { %1770 = vmatpush1.bf16.msra.mxu0 %v2200_v35 }
  0x3d   :  { %323 = vmatmul.mubr.f32.vlgmr.msra.gmra.mrb[8].mxu1 %v2084_v0  ;;  %1788 = vmatprep.subr.bf16.mxu0 %v2152_v11 }
  0x3e   :  { %1742 = vmatpush1.bf16.msra.mxu1 %v2157_v15  ;;  %470 = vmatprep.mubr.f32.mxu1 %v2084_v0 }
  0x3f   :  { %1744 = vmatprep.subr.bf16.mxu1 %v2160_v16 }
  0x42   :  { %1746 = vmatpush1.bf16.msra.mxu1 %v2169_v22 }
  0x43   :  { %1748 = vmatprep.subr.bf16.mxu1 %v2175_v24 }
  0x46   :  { %1750 = vmatpush1.bf16.msra.mxu1 %v2187_v30 }
  0x47   :  { %1752 = vmatprep.subr.bf16.mxu1 %v2190_v31 }
  0x4a   :  { %1754 = vmatpush1.bf16.msra.mxu1 %v2200_v35 }
  0x4b   :  { %1772 = vmatprep.subr.bf16.mxu1 %v2152_v11 }
 0x100   :  { %v2221_v37 = vpop.f32.mrb[0].mxu1  ;;  %v167_v39 = vpop.f32.mrb[0].mxu0 }
 0x101   :  { %v2223_v38 = vpop.f32.mrb[1].mxu1  ;;  %v2225_v41 = vpop.f32.mrb[1].mxu0  ;;  %v168_v52 = vadd.f32 %v167_v39, %v2238_v49 }
 0x104   :  { %v2227_v42 = vpop.f32.mrb[2].mxu1 }
 0x105   :  { %v2229_v43 = vpop.f32.mrb[3].mxu1 }
 0x106   :  { %v173_v33 = vpop.f32.mrb[2].mxu0 }
 0x107   :  { %v2280_v34 = vpop.f32.mrb[3].mxu0  ;;  %v174_v36 = vadd.f32 %v173_v33, %v2238_v49 }
 0x108   :  { %v2234_v46 = vpop.f32.mrb[4].mxu1 }
 0x109   :  { %v2236_v47 = vpop.f32.mrb[5].mxu1 }
 0x10a   :  { %v206_v39 = vadd.f32 %v2236_v47, %v2243_v53 }
 0x10c   :  { %v2240_v50 = vpop.f32.mrb[6].mxu1 }
 0x10d   :  { %v211_v51 = vpop.f32.mrb[7].mxu1 }
 0x10e   :  { %v212_v54 = vadd.f32 %v211_v51, %v2243_v53 }
 0x110   :  { %v324_v55 = vpop.f32.mrb[8].mxu1 }
 0x111   :  { %v329_v56 = vadd.f32 %v324_v55, %v168_v52  ;;  %v326_v57 = vpop.f32.mrb[9].mxu1 }
 0x112   :  { %v330_v58 = vadd.f32 %v326_v57, %v212_v54 }
 0x113   :  { %1880 = vtanh.f32 %v329_v56  ;;  %v1643_v61 = vmul.f32 -1.442695, %v329_v56 }
 0x114   :  { %1882 = vtanh.f32 %v330_v58  ;;  %v1644_v62 = vmul.f32 -1.442695, %v330_v58 }
 0x115   :  { %1884 = vpow2.f32 %v1643_v61 }
 0x116   :  { %1886 = vpow2.f32 %v1644_v62 }
 0x11d   :  { %v1881_v59 = vpop.eup %1880 }
 0x11e   :  { %347 = vrot.lane.b32.xlu0 %v1881_v59, %s2085_s2  ;;  %v1883_v60 = vpop.eup %1882 }
 0x11f   :  { %v1885_v63 = vpop.eup %1884 }
 0x120   :  { %v334_v1 = vadd.f32 1.0, %v1885_v63  ;;  %v1887_v2 = vpop.eup %1886 }
 0x121   :  { %v340_v3 = vadd.f32 1.0, %v1887_v2 }
 0x122   :  { %358 = vrot.lane.b32.xlu0 %v1883_v60, %s2085_s2  ;;  %1888 = vrcp.f32 %v334_v1 }
 0x123   :  { %1890 = vrcp.f32 %v340_v3 }
 0x12c   :  { %v1889_v4 = vpop.eup %1888 }
 0x12d   :  { %v1891_v7 = vpop.eup %1890  ;;  %v345_v10 = vmul.f32 0.0, %v1889_v4 }
 0x12e   :  { %v356_v14 = vmul.f32 0.0, %v1891_v7 }
 0x190   :  { %v348_v5 = vpop.permute.xlu0 %347 }
 0x191   :  { %v350_v6 = vmul.f32 %v1889_v4, %v348_v5 }
 0x193   :  { %352 = vrot.lane.b32.xlu1 %v350_v6, %s2085_s2 }
 0x194   :  { %v359_v8 = vpop.permute.xlu0 %358 }
 0x195   :  { %v361_v9 = vmul.f32 %v1891_v7, %v359_v8  ;;  %v54_v8 = vld [vmem:[%s2547_s0 + $0x10] sm:$0xff] }
 0x196   :  { %1637 = vmatmul.mubr.msk.f32.gmra.mrb[4].mxu0 %vm76_vm0, %v54_v8 }
 0x197   :  { %363 = vrot.lane.b32.xlu1 %v361_v9, %s2085_s2  ;;  %183 = vmatprep.mubr.f32.mxu0 %v2084_v0  ;;  %v55_v9 = vld [vmem:[%s2547_s0 + $0x18] sm:$0xff] }
 0x19a   :  { %1638 = vmatmul.mubr.msk.f32.gmra.mrb[6].mxu0 %vm76_vm0, %v55_v9 }
 0x19b   :  { %618 = vmatprep.mubr.f32.mxu0 %v2084_v0 }
 0x205   :  { %v353_v12 = vpop.permute.xlu1 %352 }
 0x206   :  { %v2250_v13 = vadd.f32 %v353_v12, %v345_v10 }
 0x208   :  { %1892 = vtanh.f32 %v2250_v13 }
 0x209   :  { %v364_v17 = vpop.permute.xlu1 %363 }
 0x20a   :  { %v2253_v18 = vadd.f32 %v364_v17, %v356_v14 }
 0x20c   :  { %1894 = vtanh.f32 %v2253_v18 }
 0x212   :  { %v1893_v19 = vpop.eup %1892 }
 0x213   :  { %369 = vrot.lane.b32.xlu0 %v1893_v19, %s2085_s2 }
 0x216   :  { %v1895_v20 = vpop.eup %1894 }
 0x217   :  { %375 = vrot.lane.b32.xlu1 %v1895_v20, %s2085_s2 }
 0x269   :  { %v179_v19 = vpop.f32.mrb[4].mxu0 }
 0x26a   :  { %v2314_v20 = vpop.f32.mrb[5].mxu0 }
 0x26d   :  { %v2316_v21 = vpop.f32.mrb[6].mxu0 }
 0x285   :  { %v370_v23 = vpop.permute.xlu0 %369 }
 0x286   :  { %v372_v25 = vmul.f32 %v1889_v4, %v370_v23  ;;  %v2318_v23 = vpop.f32.mrb[7].mxu0 }
 0x288   :  { %380 = vrot.lane.b32.xlu0 %v372_v25, %s2086_s11 }
 0x289   :  { %v376_v26 = vpop.permute.xlu1 %375 }
 0x28a   :  { %v2264_v27 = vmul.f32 %v1891_v7, %v376_v26 }
 0x28c   :  { %399 = vrot.lane.b32.xlu1 %v2264_v27, %s2087_s12 }
 0x2fa   :  { %v381_v28 = vpop.permute.xlu0 %380 }
 0x2fb   :  { %384 = vst.msk [vmem:[#allocation3] sm:$0xff] %vm383_vm1, %v381_v28 }
 0x2fe   :  { %v400_v29 = vpop.permute.xlu1 %399 }
 0x2ff   :  { %v402_v32 = vsel %vm383_vm1, %v381_v28, %v400_v29  ;;  %v180_v29 = vadd.f32 %v179_v19, %v2238_v49 }
 0x300   :  { %1645 = vmatmul.mubr.msk.f32.vlgmr.msra.gmra.mrb[10].mxu1 %vm254_vm2, %v402_v32  ;;  %v200_v32 = vadd.f32 %v2229_v43, %v2243_v53 }
 0x301   :  { %1774 = vmatpush1.bf16.msra.mxu1 %v2157_v15  ;;  %766 = vmatprep.mubr.f32.mxu1 %v2084_v0 }
 0x302   :  { %1776 = vmatprep.subr.bf16.mxu1 %v2160_v16 }
 0x305   :  { %1778 = vmatpush1.bf16.msra.mxu1 %v2169_v22 }
 0x306   :  { %1780 = vmatprep.subr.bf16.mxu1 %v2175_v24 }
 0x309   :  { %1782 = vmatpush1.bf16.msra.mxu1 %v2187_v30 }
 0x30a   :  { %1784 = vmatprep.subr.bf16.mxu1 %v2190_v31 }
 0x30d   :  { %1786 = vmatpush1.bf16.msra.mxu1 %v2200_v35 }
 0x30e   :  { %1804 = vmatprep.subr.bf16.mxu1 %v2152_v11 }
 0x3d3   :  { %v472_v40 = vpop.f32.mrb[10].mxu1 }
 0x3d4   :  { %v477_v44 = vadd.f32 %v472_v40, %v174_v36  ;;  %v474_v45 = vpop.f32.mrb[11].mxu1 }
 0x3d5   :  { %v478_v48 = vadd.f32 %v474_v45, %v206_v39 }
 0x3d6   :  { %1896 = vtanh.f32 %v477_v44  ;;  %v1646_v54 = vmul.f32 -1.442695, %v477_v44 }
 0x3d7   :  { %1898 = vtanh.f32 %v478_v48  ;;  %v1647_v55 = vmul.f32 -1.442695, %v478_v48 }
 0x3d8   :  { %1900 = vpow2.f32 %v1646_v54 }
 0x3d9   :  { %1902 = vpow2.f32 %v1647_v55 }
 0x3e0   :  { %v1897_v51 = vpop.eup %1896 }
 0x3e1   :  { %v1899_v52 = vpop.eup %1898  ;;  %495 = vrot.lane.b32.xlu0 %v1897_v51, %s2085_s2 }
 0x3e2   :  { %506 = vrot.lane.b32.xlu1 %v1899_v52, %s2085_s2  ;;  %v1901_v56 = vpop.eup %1900 }
 0x3e3   :  { %v1903_v57 = vpop.eup %1902  ;;  %v482_v58 = vadd.f32 1.0, %v1901_v56 }
 0x3e4   :  { %v488_v47 = vadd.f32 1.0, %v1903_v57 }
 0x3e5   :  { %1904 = vrcp.f32 %v482_v58 }
 0x3e6   :  { %1906 = vrcp.f32 %v488_v47 }
 0x3ef   :  { %v1905_v59 = vpop.eup %1904 }
 0x3f0   :  { %v1907_v61 = vpop.eup %1906  ;;  %v493_v2 = vmul.f32 %v1905_v59, %v2250_v13 }
 0x3f1   :  { %v504_v4 = vmul.f32 %v1907_v61, %v2253_v18 }
 0x453   :  { %v496_v60 = vpop.permute.xlu0 %495 }
 0x454   :  { %v498_v62 = vmul.f32 %v1905_v59, %v496_v60  ;;  %v507_v63 = vpop.permute.xlu1 %506 }
 0x455   :  { %v509_v1 = vmul.f32 %v1907_v61, %v507_v63 }
 0x456   :  { %500 = vrot.lane.b32.xlu0 %v498_v62, %s2085_s2 }
 0x457   :  { %511 = vrot.lane.b32.xlu1 %v509_v1, %s2085_s2 }
 0x4c8   :  { %v501_v3 = vpop.permute.xlu0 %500 }
 0x4c9   :  { %v2291_v5 = vadd.f32 %v501_v3, %v493_v2  ;;  %v512_v6 = vpop.permute.xlu1 %511 }
 0x4ca   :  { %v2293_v7 = vadd.f32 %v512_v6, %v504_v4 }
 0x4cb   :  { %1908 = vtanh.f32 %v2291_v5 }
 0x4cc   :  { %1910 = vtanh.f32 %v2293_v7 }
 0x4d5   :  { %v1909_v10 = vpop.eup %1908 }
 0x4d6   :  { %v1911_v12 = vpop.eup %1910  ;;  %517 = vrot.lane.b32.xlu0 %v1909_v10, %s2085_s2 }
 0x4d7   :  { %523 = vrot.lane.b32.xlu1 %v1911_v12, %s2085_s2 }
 0x548   :  { %v518_v13 = vpop.permute.xlu0 %517 }
 0x549   :  { %v520_v14 = vmul.f32 %v1905_v59, %v518_v13  ;;  %v524_v17 = vpop.permute.xlu1 %523 }
 0x54a   :  { %v2309_v18 = vmul.f32 %v1907_v61, %v524_v17  ;;  %v194_v17 = vadd.f32 %v2223_v38, %v2243_v53 }
 0x54b   :  { %528 = vrot.lane.b32.xlu0 %v520_v14, %s2086_s11  ;;  %v186_v14 = vadd.f32 %v2316_v21, %v2238_v49 }
 0x54c   :  { %547 = vrot.lane.b32.xlu1 %v2309_v18, %s2087_s12 }
 0x5bd   :  { %v529_v25 = vpop.permute.xlu0 %528 }
 0x5be   :  { %532 = vst.msk [vmem:[#allocation3 + $0x8] sm:$0xff] %vm383_vm1, %v529_v25  ;;  %v548_v26 = vpop.permute.xlu1 %547 }
 0x5bf   :  { %v550_v28 = vsel %vm383_vm1, %v529_v25, %v548_v26 }
 0x5c0   :  { %1648 = vmatmul.mubr.msk.f32.vlgmr.msra.gmra.mrb[8].mxu0 %vm254_vm2, %v550_v28 }
 0x5c1   :  { %1790 = vmatpush1.bf16.msra.mxu0 %v2157_v15  ;;  %908 = vmatprep.mubr.f32.mxu0 %v2084_v0 }
 0x5c2   :  { %1792 = vmatprep.subr.bf16.mxu0 %v2160_v16 }
 0x5c5   :  { %1794 = vmatpush1.bf16.msra.mxu0 %v2169_v22 }
 0x5c6   :  { %1796 = vmatprep.subr.bf16.mxu0 %v2175_v24 }
 0x5c9   :  { %1798 = vmatpush1.bf16.msra.mxu0 %v2187_v30 }
 0x5ca   :  { %1800 = vmatprep.subr.bf16.mxu0 %v2190_v31 }
 0x5cd   :  { %1802 = vmatpush1.bf16.msra.mxu0 %v2200_v35 }
 0x5ce   :  { %1820 = vmatprep.subr.bf16.mxu0 %v2152_v11 }
 0x693   :  { %v620_v33 = vpop.f32.mrb[8].mxu0 }
 0x694   :  { %v625_v36 = vadd.f32 %v620_v33, %v180_v29  ;;  %v622_v39 = vpop.f32.mrb[9].mxu0 }
 0x695   :  { %v626_v40 = vadd.f32 %v622_v39, %v200_v32 }
 0x696   :  { %1912 = vtanh.f32 %v625_v36  ;;  %v1649_v48 = vmul.f32 -1.442695, %v625_v36 }
 0x697   :  { %1914 = vtanh.f32 %v626_v40  ;;  %v1650_v51 = vmul.f32 -1.442695, %v626_v40 }
 0x698   :  { %1916 = vpow2.f32 %v1649_v48 }
 0x699   :  { %1918 = vpow2.f32 %v1650_v51 }
 0x6a0   :  { %v1913_v44 = vpop.eup %1912 }
 0x6a1   :  { %v1915_v45 = vpop.eup %1914  ;;  %643 = vrot.lane.b32.xlu0 %v1913_v44, %s2085_s2 }
 0x6a2   :  { %654 = vrot.lane.b32.xlu1 %v1915_v45, %s2085_s2  ;;  %v1917_v52 = vpop.eup %1916 }
 0x6a3   :  { %v1919_v54 = vpop.eup %1918  ;;  %v630_v55 = vadd.f32 1.0, %v1917_v52 }
 0x6a4   :  { %v636_v43 = vadd.f32 1.0, %v1919_v54 }
 0x6a5   :  { %1920 = vrcp.f32 %v630_v55 }
 0x6a6   :  { %1922 = vrcp.f32 %v636_v43 }
 0x6af   :  { %v1921_v56 = vpop.eup %1920 }
 0x6b0   :  { %v1923_v58 = vpop.eup %1922  ;;  %v641_v61 = vmul.f32 %v1921_v56, %v2291_v5 }
 0x6b1   :  { %v652_v63 = vmul.f32 %v1923_v58, %v2293_v7 }
 0x713   :  { %v644_v57 = vpop.permute.xlu0 %643 }
 0x714   :  { %v646_v47 = vmul.f32 %v1921_v56, %v644_v57  ;;  %v655_v59 = vpop.permute.xlu1 %654 }
 0x715   :  { %v657_v60 = vmul.f32 %v1923_v58, %v655_v59 }
 0x716   :  { %648 = vrot.lane.b32.xlu0 %v646_v47, %s2085_s2 }
 0x717   :  { %659 = vrot.lane.b32.xlu1 %v657_v60, %s2085_s2 }
 0x788   :  { %v649_v62 = vpop.permute.xlu0 %648 }
 0x789   :  { %v651_v1 = vadd.f32 %v649_v62, %v641_v61  ;;  %v660_v2 = vpop.permute.xlu1 %659 }
 0x78a   :  { %v662_v3 = vadd.f32 %v660_v2, %v652_v63 }
 0x78b   :  { %1924 = vtanh.f32 %v651_v1 }
 0x78c   :  { %1926 = vtanh.f32 %v662_v3 }
 0x795   :  { %v1925_v4 = vpop.eup %1924 }
 0x796   :  { %v1927_v6 = vpop.eup %1926  ;;  %665 = vrot.lane.b32.xlu0 %v1925_v4, %s2085_s2  ;;  %v192_v4 = vadd.f32 %v2221_v37, %v2238_v49 }
 0x797   :  { %671 = vrot.lane.b32.xlu1 %v1927_v6, %s2085_s2  ;;  %v188_v6 = vadd.f32 %v2318_v23, %v2243_v53 }
 0x808   :  { %v666_v8 = vpop.permute.xlu0 %665 }
 0x809   :  { %v668_v9 = vmul.f32 %v1921_v56, %v666_v8  ;;  %v672_v10 = vpop.permute.xlu1 %671 }
 0x80a   :  { %v2343_v12 = vmul.f32 %v1923_v58, %v672_v10 }
 0x80b   :  { %676 = vrot.lane.b32.xlu0 %v668_v9, %s2086_s11 }
 0x80c   :  { %695 = vrot.lane.b32.xlu1 %v2343_v12, %s2087_s12 }
 0x87d   :  { %v677_v5 = vpop.permute.xlu0 %676 }
 0x87e   :  { %680 = vst.msk [vmem:[#allocation3 + $0x10] sm:$0xff] %vm383_vm1, %v677_v5  ;;  %v696_v7 = vpop.permute.xlu1 %695 }
 0x87f   :  { %v698_v13 = vsel %vm383_vm1, %v677_v5, %v696_v7 }
 0x880   :  { %1651 = vmatmul.mubr.msk.f32.vlgmr.msra.gmra.mrb[12].mxu1 %vm254_vm2, %v698_v13 }
 0x881   :  { %1806 = vmatpush1.bf16.msra.mxu1 %v2157_v15  ;;  %1050 = vmatprep.mubr.f32.mxu1 %v2084_v0 }
 0x882   :  { %1808 = vmatprep.subr.bf16.mxu1 %v2160_v16 }
 0x885   :  { %1810 = vmatpush1.bf16.msra.mxu1 %v2169_v22 }
 0x886   :  { %1812 = vmatprep.subr.bf16.mxu1 %v2175_v24 }
 0x889   :  { %1814 = vmatpush1.bf16.msra.mxu1 %v2187_v30 }
 0x88a   :  { %1816 = vmatprep.subr.bf16.mxu1 %v2190_v31 }
 0x88d   :  { %1818 = vmatpush1.bf16.msra.mxu1 %v2200_v35 }
 0x88e   :  { %1836 = vmatprep.subr.bf16.mxu1 %v2152_v11 }
 0x953   :  { %v768_v19 = vpop.f32.mrb[12].mxu1 }
 0x954   :  { %v773_v25 = vadd.f32 %v768_v19, %v186_v14  ;;  %v770_v26 = vpop.f32.mrb[13].mxu1 }
 0x955   :  { %v774_v28 = vadd.f32 %v770_v26, %v194_v17 }
 0x956   :  { %1928 = vtanh.f32 %v773_v25  ;;  %v1652_v33 = vmul.f32 -1.442695, %v773_v25 }
 0x957   :  { %1930 = vtanh.f32 %v774_v28  ;;  %v1653_v11 = vmul.f32 -1.442695, %v774_v28 }
 0x958   :  { %1932 = vpow2.f32 %v1652_v33 }
 0x959   :  { %1934 = vpow2.f32 %v1653_v11 }
 0x960   :  { %v1929_v29 = vpop.eup %1928 }
 0x961   :  { %v1931_v32 = vpop.eup %1930  ;;  %791 = vrot.lane.b32.xlu0 %v1929_v29, %s2085_s2 }
 0x962   :  { %802 = vrot.lane.b32.xlu1 %v1931_v32, %s2085_s2  ;;  %v1933_v21 = vpop.eup %1932 }
 0x963   :  { %v1935_v36 = vpop.eup %1934  ;;  %v778_v39 = vadd.f32 1.0, %v1933_v21 }
 0x964   :  { %v784_v38 = vadd.f32 1.0, %v1935_v36 }
 0x965   :  { %1936 = vrcp.f32 %v778_v39 }
 0x966   :  { %1938 = vrcp.f32 %v784_v38 }
 0x96f   :  { %v1937_v40 = vpop.eup %1936 }
 0x970   :  { %v1939_v45 = vpop.eup %1938  ;;  %v789_v54 = vmul.f32 %v1937_v40, %v651_v1 }
 0x971   :  { %v800_v43 = vmul.f32 %v1939_v45, %v662_v3 }
 0x9d3   :  { %v792_v44 = vpop.permute.xlu0 %791 }
 0x9d4   :  { %v794_v48 = vmul.f32 %v1937_v40, %v792_v44  ;;  %v803_v51 = vpop.permute.xlu1 %802 }
 0x9d5   :  { %v805_v52 = vmul.f32 %v1939_v45, %v803_v51 }
 0x9d6   :  { %796 = vrot.lane.b32.xlu0 %v794_v48, %s2085_s2 }
 0x9d7   :  { %807 = vrot.lane.b32.xlu1 %v805_v52, %s2085_s2 }
 0xa48   :  { %v797_v55 = vpop.permute.xlu0 %796 }
 0xa49   :  { %v799_v56 = vadd.f32 %v797_v55, %v789_v54  ;;  %v808_v57 = vpop.permute.xlu1 %807 }
 0xa4a   :  { %v810_v58 = vadd.f32 %v808_v57, %v800_v43 }
 0xa4b   :  { %1940 = vtanh.f32 %v799_v56 }
 0xa4c   :  { %1942 = vtanh.f32 %v810_v58 }
 0xa55   :  { %v1941_v47 = vpop.eup %1940 }
 0xa56   :  { %v1943_v59 = vpop.eup %1942  ;;  %813 = vrot.lane.b32.xlu0 %v1941_v47, %s2085_s2 }
 0xa57   :  { %819 = vrot.lane.b32.xlu1 %v1943_v59, %s2085_s2 }
 0xac8   :  { %v814_v60 = vpop.permute.xlu0 %813 }
 0xac9   :  { %v816_v61 = vmul.f32 %v1937_v40, %v814_v60  ;;  %v820_v62 = vpop.permute.xlu1 %819 }
 0xaca   :  { %v2370_v63 = vmul.f32 %v1939_v45, %v820_v62 }
 0xacb   :  { %824 = vrot.lane.b32.xlu0 %v816_v61, %s2086_s11 }
 0xacc   :  { %837 = vrot.lane.b32.xlu1 %v2370_v63, %s2087_s12 }
 0xb3d   :  { %v825_v1 = vpop.permute.xlu0 %824 }
 0xb3e   :  { %828 = vst.msk [vmem:[#allocation3 + $0x18] sm:$0xff] %vm383_vm1, %v825_v1  ;;  %v838_v2 = vpop.permute.xlu1 %837 }
 0xb3f   :  { %v840_v3 = vsel %vm383_vm1, %v825_v1, %v838_v2 }
 0xb40   :  { %1654 = vmatmul.mubr.msk.f32.vlgmr.msra.gmra.mrb[10].mxu0 %vm254_vm2, %v840_v3 }
 0xb41   :  { %1822 = vmatpush1.bf16.msra.mxu0 %v2157_v15  ;;  %1192 = vmatprep.mubr.f32.mxu0 %v2084_v0 }
 0xb42   :  { %1824 = vmatprep.subr.bf16.mxu0 %v2160_v16 }
 0xb45   :  { %1826 = vmatpush1.bf16.msra.mxu0 %v2169_v22 }
 0xb46   :  { %1828 = vmatprep.subr.bf16.mxu0 %v2175_v24 }
 0xb49   :  { %1830 = vmatpush1.bf16.msra.mxu0 %v2187_v30 }
 0xb4a   :  { %1832 = vmatprep.subr.bf16.mxu0 %v2190_v31 }
 0xb4d   :  { %1834 = vmatpush1.bf16.msra.mxu0 %v2200_v35 }
 0xc13   :  { %v910_v8 = vpop.f32.mrb[10].mxu0 }
 0xc14   :  { %v915_v9 = vadd.f32 %v910_v8, %v192_v4  ;;  %v912_v10 = vpop.f32.mrb[11].mxu0 }
 0xc15   :  { %v916_v5 = vadd.f32 %v912_v10, %v188_v6 }
 0xc16   :  { %1944 = vtanh.f32 %v915_v9  ;;  %v1655_v14 = vmul.f32 -1.442695, %v915_v9 }
 0xc17   :  { %1946 = vtanh.f32 %v916_v5  ;;  %v1656_v17 = vmul.f32 -1.442695, %v916_v5 }
 0xc18   :  { %1948 = vpow2.f32 %v1655_v14 }
 0xc19   :  { %1950 = vpow2.f32 %v1656_v17 }
 0xc20   :  { %v1945_v7 = vpop.eup %1944 }
 0xc21   :  { %v1947_v13 = vpop.eup %1946  ;;  %933 = vrot.lane.b32.xlu0 %v1945_v7, %s2085_s2 }
 0xc22   :  { %944 = vrot.lane.b32.xlu1 %v1947_v13, %s2085_s2  ;;  %v1949_v37 = vpop.eup %1948 }
 0xc23   :  { %v1951_v19 = vpop.eup %1950  ;;  %v920_v25 = vadd.f32 1.0, %v1949_v37 }
 0xc24   :  { %v926_v23 = vadd.f32 1.0, %v1951_v19 }
 0xc25   :  { %1952 = vrcp.f32 %v920_v25 }
 0xc26   :  { %1954 = vrcp.f32 %v926_v23 }
 0xc2f   :  { %v1953_v26 = vpop.eup %1952 }
 0xc30   :  { %v1955_v29 = vpop.eup %1954  ;;  %v931_v21 = vmul.f32 %v1953_v26, %v799_v56 }
 0xc31   :  { %v942_v39 = vmul.f32 %v1955_v29, %v810_v58  ;;  %v198_v58 = vadd.f32 %v2227_v42, %v2238_v49 }
 0xc93   :  { %v934_v28 = vpop.permute.xlu0 %933 }
 0xc94   :  { %v936_v32 = vmul.f32 %v1953_v26, %v934_v28  ;;  %v945_v33 = vpop.permute.xlu1 %944 }
 0xc95   :  { %v947_v11 = vmul.f32 %v1955_v29, %v945_v33 }
 0xc96   :  { %938 = vrot.lane.b32.xlu0 %v936_v32, %s2085_s2  ;;  %v176_v32 = vadd.f32 %v2280_v34, %v2243_v53 }
 0xc97   :  { %949 = vrot.lane.b32.xlu1 %v947_v11, %s2085_s2 }
 0xd08   :  { %v939_v36 = vpop.permute.xlu0 %938 }
 0xd09   :  { %v941_v38 = vadd.f32 %v939_v36, %v931_v21  ;;  %v950_v40 = vpop.permute.xlu1 %949 }
 0xd0a   :  { %v952_v44 = vadd.f32 %v950_v40, %v942_v39 }
 0xd0b   :  { %1956 = vtanh.f32 %v941_v38 }
 0xd0c   :  { %1958 = vtanh.f32 %v952_v44 }
 0xd15   :  { %v1957_v45 = vpop.eup %1956 }
 0xd16   :  { %v1959_v48 = vpop.eup %1958  ;;  %955 = vrot.lane.b32.xlu0 %v1957_v45, %s2085_s2 }
 0xd17   :  { %961 = vrot.lane.b32.xlu1 %v1959_v48, %s2085_s2 }
 0xd88   :  { %v956_v51 = vpop.permute.xlu0 %955 }
 0xd89   :  { %v958_v52 = vmul.f32 %v1953_v26, %v956_v51  ;;  %v962_v54 = vpop.permute.xlu1 %961 }
 0xd8a   :  { %v2396_v55 = vmul.f32 %v1955_v29, %v962_v54  ;;  %v204_v29 = vadd.f32 %v2234_v46, %v2238_v49 }
 0xd8b   :  { %966 = vrot.lane.b32.xlu0 %v958_v52, %s2086_s11 }
 0xd8c   :  { %979 = vrot.lane.b32.xlu1 %v2396_v55, %s2087_s12 }
 0xdfd   :  { %v967_v43 = vpop.permute.xlu0 %966 }
 0xdfe   :  { %970 = vst.msk [vmem:[#allocation3 + $0x20] sm:$0xff] %vm383_vm1, %v967_v43  ;;  %v980_v56 = vpop.permute.xlu1 %979 }
 0xdff   :  { %v982_v57 = vsel %vm383_vm1, %v967_v43, %v980_v56 }
 0xe00   :  { %1657 = vmatmul.mubr.msk.f32.vlgmr.msra.gmra.mrb[14].mxu1 %vm254_vm2, %v982_v57 }
 0xe01   :  { %1838 = vmatpush1.bf16.msra.mxu1 %v2157_v15  ;;  %1334 = vmatprep.mubr.f32.mxu1 %v2084_v0  ;;  %v182_v15 = vadd.f32 %v2314_v20, %v2243_v53 }
 0xe02   :  { %1840 = vmatprep.subr.bf16.mxu1 %v2160_v16 }
 0xe05   :  { %1842 = vmatpush1.bf16.msra.mxu1 %v2169_v22 }
 0xe06   :  { %1844 = vmatprep.subr.bf16.mxu1 %v2175_v24 }
 0xe09   :  { %1846 = vmatpush1.bf16.msra.mxu1 %v2187_v30 }
 0xe0a   :  { %1848 = vmatprep.subr.bf16.mxu1 %v2190_v31 }
 0xe0d   :  { %1850 = vmatpush1.bf16.msra.mxu1 %v2200_v35 }
 0xed3   :  { %v1052_v47 = vpop.f32.mrb[14].mxu1 }
 0xed4   :  { %v1057_v0 = vadd.f32 %v1052_v47, %v198_v58  ;;  %v1054_v59 = vpop.f32.mrb[15].mxu1 }
 0xed5   :  { %v1058_v16 = vadd.f32 %v1054_v59, %v182_v15 }
 0xed6   :  { %1960 = vtanh.f32 %v1057_v0  ;;  %v1658_v30 = vmul.f32 -1.442695, %v1057_v0 }
 0xed7   :  { %1962 = vtanh.f32 %v1058_v16  ;;  %v1659_v31 = vmul.f32 -1.442695, %v1058_v16 }
 0xed8   :  { %1964 = vpow2.f32 %v1658_v30 }
 0xed9   :  { %1966 = vpow2.f32 %v1659_v31 }
 0xee0   :  { %v1961_v22 = vpop.eup %1960 }
 0xee1   :  { %v1963_v24 = vpop.eup %1962  ;;  %1075 = vrot.lane.b32.xlu0 %v1961_v22, %s2085_s2 }
 0xee2   :  { %1086 = vrot.lane.b32.xlu1 %v1963_v24, %s2085_s2  ;;  %v1965_v35 = vpop.eup %1964 }
 0xee3   :  { %v1967_v42 = vpop.eup %1966  ;;  %v1062_v60 = vadd.f32 1.0, %v1965_v35 }
 0xee4   :  { %v1068_v20 = vadd.f32 1.0, %v1967_v42 }
 0xee5   :  { %1968 = vrcp.f32 %v1062_v60 }
 0xee6   :  { %1970 = vrcp.f32 %v1068_v20 }
 0xeef   :  { %v1969_v61 = vpop.eup %1968 }
 0xef0   :  { %v1971_v1 = vpop.eup %1970  ;;  %v1073_v6 = vmul.f32 %v1969_v61, %v941_v38 }
 0xef1   :  { %v1084_v9 = vmul.f32 %v1971_v1, %v952_v44 }
 0xf53   :  { %v1076_v62 = vpop.permute.xlu0 %1075 }
 0xf54   :  { %v1078_v2 = vmul.f32 %v1969_v61, %v1076_v62  ;;  %v1087_v3 = vpop.permute.xlu1 %1086  ;;  %v210_v62 = vadd.f32 %v2240_v50, %v2238_v49 }
 0xf55   :  { %v1089_v4 = vmul.f32 %v1971_v1, %v1087_v3 }
 0xf56   :  { %1080 = vrot.lane.b32.xlu0 %v1078_v2, %s2085_s2 }
 0xf57   :  { %1091 = vrot.lane.b32.xlu1 %v1089_v4, %s2085_s2 }
 0xfc8   :  { %v1081_v8 = vpop.permute.xlu0 %1080 }
 0xfc9   :  { %v1083_v10 = vadd.f32 %v1081_v8, %v1073_v6  ;;  %v1092_v5 = vpop.permute.xlu1 %1091 }
 0xfca   :  { %v1094_v7 = vadd.f32 %v1092_v5, %v1084_v9 }
 0xfcb   :  { %1972 = vtanh.f32 %v1083_v10 }
 0xfcc   :  { %1974 = vtanh.f32 %v1094_v7 }
 0xfd5   :  { %v1973_v13 = vpop.eup %1972 }
 0xfd6   :  { %v1975_v14 = vpop.eup %1974  ;;  %1097 = vrot.lane.b32.xlu0 %v1973_v13, %s2085_s2 }
 0xfd7   :  { %1103 = vrot.lane.b32.xlu1 %v1975_v14, %s2085_s2 }
0x1048   :  { %v1098_v17 = vpop.permute.xlu0 %1097 }
0x1049   :  { %v1100_v37 = vmul.f32 %v1969_v61, %v1098_v17  ;;  %v1104_v19 = vpop.permute.xlu1 %1103 }
0x104a   :  { %v2422_v25 = vmul.f32 %v1971_v1, %v1104_v19  ;;  %v170_v1 = vadd.f32 %v2225_v41, %v2243_v53 }
0x104b   :  { %1108 = vrot.lane.b32.xlu0 %v1100_v37, %s2086_s11 }
0x104c   :  { %1121 = vrot.lane.b32.xlu1 %v2422_v25, %s2087_s12 }
0x10bd   :  { %v1109_v23 = vpop.permute.xlu0 %1108 }
0x10be   :  { %1112 = vst.msk [vmem:[#allocation3 + $0x28] sm:$0xff] %vm383_vm1, %v1109_v23  ;;  %v1122_v26 = vpop.permute.xlu1 %1121 }
0x10bf   :  { %v1124_v28 = vsel %vm383_vm1, %v1109_v23, %v1122_v26 }
0x10c0   :  { %1660 = vmatmul.mubr.msk.f32.vlgmr.msra.gmra.mrb[12].mxu0 %vm254_vm2, %v1124_v28 }
0x1193   :  { %v1194_v33 = vpop.f32.mrb[12].mxu0 }
0x1194   :  { %v1199_v11 = vadd.f32 %v1194_v33, %v204_v29  ;;  %v1196_v21 = vpop.f32.mrb[13].mxu0 }
0x1195   :  { %v1200_v36 = vadd.f32 %v1196_v21, %v176_v32 }
0x1196   :  { %1976 = vtanh.f32 %v1199_v11  ;;  %v1661_v40 = vmul.f32 -1.442695, %v1199_v11 }
0x1197   :  { %1978 = vtanh.f32 %v1200_v36  ;;  %v1662_v44 = vmul.f32 -1.442695, %v1200_v36 }
0x1198   :  { %1980 = vpow2.f32 %v1661_v40  ;;  %v1459_v40 = vld [vmem:[%s2551_s4 + $0x8] sm:$0xff] }
0x1199   :  { %1982 = vpow2.f32 %v1662_v44 }
0x11a0   :  { %v1977_v39 = vpop.eup %1976 }
0x11a1   :  { %v1979_v38 = vpop.eup %1978  ;;  %1217 = vrot.lane.b32.xlu0 %v1977_v39, %s2085_s2 }
0x11a2   :  { %1228 = vrot.lane.b32.xlu1 %v1979_v38, %s2085_s2  ;;  %v1981_v46 = vpop.eup %1980  ;;  %v1458_v38 = vld [vmem:[%s2551_s4] sm:$0xff] }
0x11a3   :  { %v1983_v45 = vpop.eup %1982  ;;  %v1204_v48 = vadd.f32 1.0, %v1981_v46  ;;  %v1851_v44 = vpack.c.bf16 %v1459_v40, %v1458_v38 }
0x11a4   :  { %v1210_v34 = vadd.f32 1.0, %v1983_v45 }
0x11a5   :  { %1984 = vrcp.f32 %v1204_v48  ;;  %v1462_v48 = vld [vmem:[%s2551_s4 + $0x20] sm:$0xff]  ;;  %1852 = vmatprep.subr.bf16.mxu0 %v1851_v44 }
0x11a6   :  { %1986 = vrcp.f32 %v1210_v34  ;;  %v1463_v34 = vld [vmem:[%s2551_s4 + $0x28] sm:$0xff]  ;;  %1854 = vmatpush3.bf16.msra.mxu0 %v1851_v44 }
0x11af   :  { %v1985_v51 = vpop.eup %1984 }
0x11b0   :  { %v1987_v54 = vpop.eup %1986  ;;  %v1215_v58 = vmul.f32 %v1985_v51, %v1083_v10 }
0x11b1   :  { %v1226_v47 = vmul.f32 %v1987_v54, %v1094_v7 }
0x1213   :  { %v1218_v52 = vpop.permute.xlu0 %1217 }
0x1214   :  { %v1220_v43 = vmul.f32 %v1985_v51, %v1218_v52  ;;  %v1229_v56 = vpop.permute.xlu1 %1228  ;;  %v1464_v52 = vld [vmem:[%s2551_s4 + $0x30] sm:$0xff] }
0x1215   :  { %v1231_v57 = vmul.f32 %v1987_v54, %v1229_v56 }
0x1216   :  { %1222 = vrot.lane.b32.xlu0 %v1220_v43, %s2085_s2 }
0x1217   :  { %1233 = vrot.lane.b32.xlu1 %v1231_v57, %s2085_s2 }
0x1288   :  { %v1223_v15 = vpop.permute.xlu0 %1222 }
0x1289   :  { %v1225_v0 = vadd.f32 %v1223_v15, %v1215_v58  ;;  %v1234_v59 = vpop.permute.xlu1 %1233 }
0x128a   :  { %v1236_v16 = vadd.f32 %v1234_v59, %v1226_v47 }
0x128b   :  { %1988 = vtanh.f32 %v1225_v0 }
0x128c   :  { %1990 = vtanh.f32 %v1236_v16 }
0x1295   :  { %v1989_v22 = vpop.eup %1988 }
0x1296   :  { %v1991_v24 = vpop.eup %1990  ;;  %1239 = vrot.lane.b32.xlu0 %v1989_v22, %s2085_s2 }
0x1297   :  { %1245 = vrot.lane.b32.xlu1 %v1991_v24, %s2085_s2 }
0x1308   :  { %v1240_v30 = vpop.permute.xlu0 %1239 }
0x1309   :  { %v1242_v31 = vmul.f32 %v1985_v51, %v1240_v30  ;;  %v1246_v35 = vpop.permute.xlu1 %1245  ;;  %v1859_v51 = vpack.c.bf16 %v1463_v34, %v1462_v48 }
0x130a   :  { %v1248_v42 = vmul.f32 %v1987_v54, %v1246_v35  ;;  %v1465_v54 = vld [vmem:[%s2551_s4 + $0x38] sm:$0xff] }
0x130b   :  { %1250 = vrot.lane.b32.xlu0 %v1242_v31, %s2086_s11  ;;  %v1863_v56 = vpack.c.bf16 %v1465_v54, %v1464_v52 }
0x130c   :  { %1263 = vrot.lane.b32.xlu1 %v1248_v42, %s2087_s12 }
0x137d   :  { %v1251_v60 = vpop.permute.xlu0 %1250 }
0x137e   :  { %1254 = vst.msk [vmem:[#allocation3 + $0x30] sm:$0xff] %vm383_vm1, %v1251_v60  ;;  %v1264_v20 = vpop.permute.xlu1 %1263 }
0x137f   :  { %v1266_v61 = vsel %vm383_vm1, %v1251_v60, %v1264_v20  ;;  %v1402_v20 = vld [vmem:[#allocation3] sm:$0xff] }
0x1380   :  { %1663 = vmatmul.mubr.msk.f32.vlgmr.msra.gmra.mrb[16].mxu1 %vm254_vm2, %v1266_v61  ;;  %v1403_v61 = vld [vmem:[#allocation3 + $0x8] sm:$0xff] }
0x1453   :  { %v1336_v2 = vpop.f32.mrb[16].mxu1 }
0x1454   :  { %v1341_v3 = vadd.f32 %v1336_v2, %v210_v62  ;;  %v1338_v4 = vpop.f32.mrb[17].mxu1  ;;  %v1404_v2 = vld [vmem:[#allocation3 + $0x10] sm:$0xff] }
0x1455   :  { %v1342_v6 = vadd.f32 %v1338_v4, %v170_v1 }
0x1456   :  { %v1664_v5 = vmul.f32 -1.442695, %v1341_v3 }
0x1457   :  { %1992 = vtanh.f32 %v1342_v6  ;;  %v1665_v10 = vmul.f32 -1.442695, %v1342_v6 }
0x1458   :  { %1994 = vtanh.f32 %v1341_v3 }
0x1459   :  { %1996 = vpow2.f32 %v1665_v10 }
0x145a   :  { %1998 = vpow2.f32 %v1664_v5  ;;  %v1406_v5 = vld [vmem:[#allocation3 + $0x20] sm:$0xff] }
0x1461   :  { %v1993_v8 = vpop.eup %1992 }
0x1462   :  { %1370 = vrot.lane.b32.xlu0 %v1993_v8, %s2085_s2  ;;  %v1995_v9 = vpop.eup %1994  ;;  %v1405_v8 = vld [vmem:[#allocation3 + $0x18] sm:$0xff] }
0x1463   :  { %v1997_v49 = vpop.eup %1996 }
0x1464   :  { %v1352_v50 = vadd.f32 1.0, %v1997_v49  ;;  %v1999_v7 = vpop.eup %1998 }
0x1465   :  { %v1346_v41 = vadd.f32 1.0, %v1999_v7  ;;  %v1407_v7 = vld [vmem:[#allocation3 + $0x28] sm:$0xff] }
0x1466   :  { %1359 = vrot.lane.b32.xlu0 %v1995_v9, %s2085_s2  ;;  %2000 = vrcp.f32 %v1352_v50 }
0x1467   :  { %2002 = vrcp.f32 %v1346_v41 }
0x1470   :  { %v2001_v53 = vpop.eup %2000 }
0x1471   :  { %v2452_v17 = vpop.eup %2002  ;;  %v1368_v23 = vmul.f32 %v2001_v53, %v1236_v16 }
0x1472   :  { %v1357_v33 = vmul.f32 %v2452_v17, %v1225_v0 }
0x14d4   :  { %v1371_v13 = vpop.permute.xlu0 %1370 }
0x14d5   :  { %v1373_v14 = vmul.f32 %v2001_v53, %v1371_v13  ;;  %v1408_v13 = vld [vmem:[#allocation3 + $0x30] sm:$0xff] }
0x14d7   :  { %1375 = vrot.lane.b32.xlu1 %v1373_v14, %s2085_s2 }
0x14d8   :  { %v1360_v37 = vpop.permute.xlu0 %1359 }
0x14d9   :  { %v1362_v19 = vmul.f32 %v2452_v17, %v1360_v37 }
0x14db   :  { %1364 = vrot.lane.b32.xlu1 %v1362_v19, %s2085_s2 }
0x1549   :  { %v1376_v26 = vpop.permute.xlu1 %1375 }
0x154a   :  { %v1378_v28 = vadd.f32 %v1376_v26, %v1368_v23  ;;  %v1666_v26 = vld [vmem:[%s2552_s5] ss:$0 sm:$0xff]  ;;  %s2052_s5 = scalar_lea.vmem %s1616_s8, 1024 }
0x154b   :  { %p2053_p2 = scmp.ne.s32.totalorder %s1616_s8, %s2052_s5  ;;  %p2058_p4 = scmp.lt.s32.totalorder %s2052_s5, %s2052_s5 }
0x154c   :  { %2004 = vtanh.f32 %v1378_v28 }
0x154d   :  { %v1365_v32 = vpop.permute.xlu1 %1364  ;;  %p2059_p5 = por %p2058_p4, %p2057_p3 }
0x154e   :  { %v1367_v11 = vadd.f32 %v1365_v32, %v1357_v33 }
0x154f   :  { %p2060_p6 = pnand %p2059_p5, %p2053_p2 }
0x1550   :  { %2006 = vtanh.f32 %v1367_v11 }
0x1556   :  { %v2005_v29 = vpop.eup %2004 }
0x1557   :  { %1387 = vrot.lane.b32.xlu0 %v2005_v29, %s2085_s2 }
0x155b   :  { %1256 = vrot.lane.b32.xlu0 %v1248_v42, %s2086_s11 }
0x155f   :  { %972 = vrot.lane.b32.xlu0 %v2396_v55, %s2086_s11 }
0x1563   :  { %682 = vrot.lane.b32.xlu0 %v2343_v12, %s2086_s11  ;;  %v2007_v12 = vpop.eup %2006 }
0x1567   :  { %534 = vrot.lane.b32.xlu0 %v2309_v18, %s2086_s11 }
0x15c9   :  { %v1388_v21 = vpop.permute.xlu0 %1387 }
0x15ca   :  { %v1390_v36 = vmul.f32 %v2001_v53, %v1388_v21 }
0x15cc   :  { %1398 = vrot.lane.b32.xlu1 %v1390_v36, %s2086_s11 }
0x15cd   :  { %v1257_v39 = vpop.permute.xlu0 %1256 }
0x15ce   :  { %1260 = vst.msk [vmem:[#allocation4 + $0x8] sm:$0xff] %vm383_vm1, %v1257_v39 }
0x15d0   :  { %1114 = vrot.lane.b32.xlu1 %v2422_v25, %s2086_s11  ;;  %v1460_v25 = vld [vmem:[%s2551_s4 + $0x10] sm:$0xff] }
0x15d1   :  { %v973_v55 = vpop.permute.xlu0 %972 }
0x15d2   :  { %976 = vst.msk [vmem:[#allocation4 + $0x18] sm:$0xff] %vm383_vm1, %v973_v55 }
0x15d4   :  { %830 = vrot.lane.b32.xlu1 %v2370_v63, %s2086_s11  ;;  %v1461_v63 = vld [vmem:[%s2551_s4 + $0x18] sm:$0xff] }
0x15d5   :  { %v683_v18 = vpop.permute.xlu0 %682  ;;  %v1855_v45 = vpack.c.bf16 %v1461_v63, %v1460_v25  ;;  %v1411_v43 = vld [vmem:[#allocation4 + $0x8] sm:$0xff] }
0x15d6   :  { %686 = vst.msk [vmem:[#allocation4 + $0x28] sm:$0xff] %vm383_vm1, %v683_v18 }
0x15d7   :  { %1856 = vmatprep.subr.bf16.mxu0 %v1855_v45 }
0x15d8   :  { %1381 = vrot.lane.b32.xlu1 %v2007_v12, %s2085_s2  ;;  %1858 = vmatpush3.bf16.msra.mxu0 %v1855_v45 }
0x15d9   :  { %v535_v46 = vpop.permute.xlu0 %534  ;;  %1860 = vmatprep.subr.bf16.mxu0 %v1859_v51  ;;  %v1413_v22 = vld [vmem:[#allocation4 + $0x18] sm:$0xff] }
0x15da   :  { %538 = vst.msk [vmem:[#allocation4 + $0x30] sm:$0xff] %vm383_vm1, %v535_v46 }
0x15dc   :  { %386 = vrot.lane.b32.xlu1 %v2264_v27, %s2086_s11  ;;  %1862 = vmatpush3.bf16.msra.mxu0 %v1859_v51 }
0x15dd   :  { %1864 = vmatprep.subr.bf16.mxu0 %v1863_v56  ;;  %v1415_v30 = vld [vmem:[#allocation4 + $0x28] sm:$0xff] }
0x15e0   :  { %1428 = vrot.lane.b32.xlu1 %v1411_v43, %s2085_s2  ;;  %1866 = vmatpush3.bf16.msra.mxu0 %v1863_v56 }
0x15e1   :  { %v1416_v31 = vld [vmem:[#allocation4 + $0x30] sm:$0xff] }
0x163e   :  { %v1399_v27 = vpop.permute.xlu1 %1398 }
0x163f   :  { %1401 = vst.msk [vmem:[#allocation4] sm:$0xff] %vm383_vm1, %v1399_v27 }
0x1642   :  { %v1115_v57 = vpop.permute.xlu1 %1114 }
0x1643   :  { %1118 = vst.msk [vmem:[#allocation4 + $0x10] sm:$0xff] %vm383_vm1, %v1115_v57 }
0x1646   :  { %v831_v58 = vpop.permute.xlu1 %830  ;;  %v1410_v15 = vld [vmem:[#allocation4] sm:$0xff] }
0x1647   :  { %834 = vst.msk [vmem:[#allocation4 + $0x20] sm:$0xff] %vm383_vm1, %v831_v58  ;;  %1426 = vrot.lane.b32.xlu0 %v1410_v15, %s2085_s2 }
0x164a   :  { %v1382_v47 = vpop.permute.xlu1 %1381  ;;  %v1412_v0 = vld [vmem:[#allocation4 + $0x10] sm:$0xff] }
0x164b   :  { %v1384_v59 = vmul.f32 %v2452_v17, %v1382_v47  ;;  %1430 = vrot.lane.b32.xlu0 %v1412_v0, %s2085_s2 }
0x164d   :  { %1392 = vrot.lane.b32.xlu1 %v1384_v59, %s2086_s11 }
0x164e   :  { %v387_v16 = vpop.permute.xlu1 %386  ;;  %v1414_v24 = vld [vmem:[#allocation4 + $0x20] sm:$0xff] }
0x164f   :  { %390 = vst.msk [vmem:[#allocation4 + $0x38] sm:$0xff] %vm383_vm1, %v387_v16  ;;  %1432 = vrot.lane.b32.xlu0 %v1413_v22, %s2085_s2 }
0x1651   :  { %1434 = vrot.lane.b32.xlu1 %v1414_v24, %s2085_s2 }
0x1652   :  { %v1429_v42 = vpop.permute.xlu1 %1428 }
0x1653   :  { %1436 = vrot.lane.b32.xlu0 %v1415_v30, %s2085_s2  ;;  %v1451_v1 = vsel %vm383_vm1, %v1403_v61, %v1429_v42 }
0x1655   :  { %1438 = vrot.lane.b32.xlu1 %v1416_v31, %s2085_s2 }
0x1656   :  { %v1417_v35 = vld [vmem:[#allocation4 + $0x38] sm:$0xff] }
0x1657   :  { %1440 = vrot.lane.b32.xlu0 %v1417_v35, %s2085_s2 }
0x16b9   :  { %v1427_v60 = vpop.permute.xlu0 %1426 }
0x16ba   :  { %v1450_v62 = vsel %vm383_vm1, %v1402_v20, %v1427_v60 }
0x16bb   :  { %1707 = vmatprep.mubr.msk.f32.mxu0 %vm254_vm2, %v1450_v62 }
0x16bc   :  { %1708 = vmatmul.mubr.msk.f32.vlgmr.msra.gmra.mrb[14].mxu0 %vm254_vm2, %v1451_v1 }
0x16bd   :  { %v1431_v3 = vpop.permute.xlu0 %1430 }
0x16be   :  { %v1452_v4 = vsel %vm383_vm1, %v1404_v2, %v1431_v3 }
0x16bf   :  { %v1393_v6 = vpop.permute.xlu1 %1392  ;;  %1710 = vmatprep.mubr.msk.f32.mxu0 %vm254_vm2, %v1452_v4 }
0x16c0   :  { %1396 = vst.msk [vmem:[#allocation3 + $0x38] sm:$0xff] %vm383_vm1, %v1393_v6 }
0x16c1   :  { %v1433_v9 = vpop.permute.xlu0 %1432 }
0x16c2   :  { %v1453_v10 = vsel %vm383_vm1, %v1405_v8, %v1433_v9 }
0x16c3   :  { %v1435_v49 = vpop.permute.xlu1 %1434  ;;  %1711 = vmatmul.mubr.msk.f32.gmra.mrb[16].mxu0 %vm254_vm2, %v1453_v10 }
0x16c4   :  { %v1454_v50 = vsel %vm383_vm1, %v1406_v5, %v1435_v49 }
0x16c5   :  { %v1437_v41 = vpop.permute.xlu0 %1436  ;;  %1713 = vmatprep.mubr.msk.f32.mxu0 %vm254_vm2, %v1454_v50 }
0x16c6   :  { %v1455_v53 = vsel %vm383_vm1, %v1407_v7, %v1437_v41 }
0x16c7   :  { %v1439_v14 = vpop.permute.xlu1 %1438  ;;  %1714 = vmatmul.mubr.msk.f32.gmra.mrb[18].mxu0 %vm254_vm2, %v1455_v53  ;;  %v1409_v37 = vld [vmem:[#allocation3 + $0x38] sm:$0xff] }
0x16c8   :  { %v1456_v17 = vsel %vm383_vm1, %v1408_v13, %v1439_v14 }
0x16c9   :  { %v1441_v19 = vpop.permute.xlu0 %1440  ;;  %1716 = vmatprep.mubr.msk.f32.mxu0 %vm254_vm2, %v1456_v17 }
0x16ca   :  { %v1457_v23 = vsel %vm383_vm1, %v1409_v37, %v1441_v19 }
0x16cb   :  { %1717 = vmatmul.mubr.msk.f32.gmra.mrb[20].mxu0 %vm254_vm2, %v1457_v23 }
0x178f   :  { %v1709_v28 = vpop.f32.mrb[14].mxu0 }
0x1790   :  { %v1569_v29 = vadd.f32 %v1709_v28, %v1666_v26  ;;  %v1563_v32 = vpop.f32.mrb[15].mxu0 }
0x1791   :  { %v1564_v33 = vadd.f32 %v1666_v26, %v1563_v32 }
0x1792   :  { %1603 = vst [vmem:[#allocation10 + $0x8] sm:$0xff] %v1569_v29 }
0x1793   :  { %1602 = vst [vmem:[#allocation10] sm:$0xff] %v1564_v33 }
0x1796   :  { %v1712_v11 = vpop.f32.mrb[16].mxu0 }
0x1797   :  { %v1579_v21 = vadd.f32 %v1712_v11, %v1666_v26  ;;  %v1573_v36 = vpop.f32.mrb[17].mxu0 }
0x1798   :  { %v1574_v39 = vadd.f32 %v1666_v26, %v1573_v36 }
0x1799   :  { %1605 = vst [vmem:[#allocation10 + $0x18] sm:$0xff] %v1579_v21 }
0x179a   :  { %1604 = vst [vmem:[#allocation10 + $0x10] sm:$0xff] %v1574_v39  ;;  %v1715_v55 = vpop.f32.mrb[18].mxu0 }
0x179b   :  { %v1589_v18 = vadd.f32 %v1715_v55, %v1666_v26  ;;  %v1583_v12 = vpop.f32.mrb[19].mxu0 }
0x179c   :  { %v1584_v38 = vadd.f32 %v1666_v26, %v1583_v12 }
0x179d   :  { %1607 = vst [vmem:[#allocation10 + $0x28] sm:$0xff] %v1589_v18 }
0x179e   :  { %1606 = vst [vmem:[#allocation10 + $0x20] sm:$0xff] %v1584_v38  ;;  %v1718_v40 = vpop.f32.mrb[20].mxu0 }
0x179f   :  { %v1599_v25 = vadd.f32 %v1718_v40, %v1666_v26  ;;  %v1593_v44 = vpop.f32.mrb[21].mxu0 }
0x17a0   :  { %v1594_v63 = vadd.f32 %v1666_v26, %v1593_v44 }
0x17a1   :  { %1609 = vst [vmem:[#allocation10 + $0x38] sm:$0xff] %v1599_v25 }
0x17a2   :  { %1608 = vst [vmem:[#allocation10 + $0x30] sm:$0xff] %v1594_v63 }
0x17a3   :  { %2063 = shalt.err (!%p2060_p6)
}
0x17a4   :  { %s2064_s10 = scalar_lea.hbm %s2553_s6, 1024 }
0x17a5   :  { %p2065_p7 = scmp.ne.s32.totalorder %s2553_s6, %s2064_s10  ;;  %p2068_p8 = scmp.lt.u32.totalorder %s2064_s10, %s2553_s6 }
0x17a7   :  { %p2070_p9 = pnand %p2068_p8, %p2065_p7 }
0x17a9   :  { %2073 = shalt.err (!%p2070_p9)
}
0x17aa   :  { %s2089_s15 = smov 128   ;;  %s2090_s16 = smov 8  }
0x17ab   :  { %1621 = dma.vmem_to_hbm [thread:$0]  %s1616_s8, 1024, %s2553_s6, [#allocation7], %s2089_s15, %s2089_s15, %s2090_s16  }
0x17ac   :  { %2078 = dma.done.wait [#allocation7], 1024  }
0x17ad   :  { %2079 = vsyncadd [#allocation7], 4294966272 }
0x17ae   :  { %1625 = vsyncpa [#allocation6], 1 }
0x17af   :  { %1626 = vsyncpa [#allocation9], 1 }
0x17b0   :  { %1627 = vsyncpa [#allocation7], 1 }

</bundles_post_ra>
